<compile_context>
chip_gen: v7x
topology: tpu7x:2x2x1
jax: 0.10.0
libtpu: 0.0.40
codegen_flags: <defaults>
</compile_context>

<pallas_src>
import functools
import math

import numpy as np

import jax
import jax.numpy as jnp
from jax import lax
from jax.experimental import pallas as pl
from jax.experimental.pallas import tpu as pltpu

EPS = 1e-5  # nn.LayerNorm default eps


def _layernorm(x, w, b):
    # Two-pass (centered) variance: matches the reference exactly and avoids the
    # E[x^2] - mean^2 cancellation flagged in review.
    m = jnp.mean(x, axis=-1, keepdims=True)
    xc = x - m
    var = jnp.mean(xc * xc, axis=-1, keepdims=True)
    return xc * lax.rsqrt(var + EPS) * w + b


def transformer_encoder_kernel(num_heads, kv_chunk, mlp_chunk, precise,
                               x_ref,
                               wqkv_ref, bqkv_ref,
                               wo_ref, bo_ref,
                               ln1w_ref, ln1b_ref,
                               ln2w_ref, ln2b_ref,
                               w1_ref, b1_ref,
                               w2_ref, b2_ref,
                               out_ref,
                               qkv_s, ctx_s):
    Bb, S, E = x_ref.shape
    H = num_heads
    Dh = E // H
    R = Bb * S
    mm_dtype = wqkv_ref.dtype          # matmul operand dtype (bf16 by default)

    x = x_ref[...].astype(jnp.float32).reshape(R, E)

    # ---- pre-LN 1 + fused QKV projection (1/sqrt(Dh) folded into Q weights).
    # The result is written to VMEM scratch so the head loop works from refs
    # (bounds vreg live ranges across the statically unrolled loop).
    xn = _layernorm(x, ln1w_ref[...], ln1b_ref[...])
    qkv = jnp.dot(xn.astype(mm_dtype), wqkv_ref[...],
                  preferred_element_type=jnp.float32) + bqkv_ref[...]
    qkv_s[...] = qkv.reshape(Bb, S, 3 * E).astype(mm_dtype)

    # ---- multi-head self-attention: flash-style online softmax over KV chunks.
    # Each head writes its context to its column slot of ctx_s; Wo is applied as
    # ONE full-K (E,E) matmul after the loop (no per-head low-K accumulation).
    # TODO(synk): for Dh < 128 the per-head lane slices are masked loads; a
    # head-major qkv layout would make them lane-aligned for real head dims.
    num_kv = S // kv_chunk
    for h in range(H):                                   # H static & small
        q0, k0, v0 = h * Dh, E + h * Dh, 2 * E + h * Dh
        qh = qkv_s[:, :, q0:q0 + Dh]                     # (Bb, S, Dh)
        m_i = l_i = acc = None
        for c in range(num_kv):                          # static chunk loop
            c0 = c * kv_chunk
            kh = qkv_s[:, c0:c0 + kv_chunk, k0:k0 + Dh]  # (Bb, Ck, Dh)
            vh = qkv_s[:, c0:c0 + kv_chunk, v0:v0 + Dh]
            s = jnp.einsum('bqd,bkd->bqk', qh, kh,
                           preferred_element_type=jnp.float32)
            m_c = jnp.max(s, axis=-1, keepdims=True)
            if c == 0:
                m_i = m_c
                p = jnp.exp(s - m_i)
                l_i = jnp.sum(p, axis=-1, keepdims=True)
                acc = jnp.einsum('bqk,bkd->bqd', p.astype(mm_dtype), vh,
                                 preferred_element_type=jnp.float32)
            else:
                m_n = jnp.maximum(m_i, m_c)
                alpha = jnp.exp(m_i - m_n)
                p = jnp.exp(s - m_n)
                l_i = alpha * l_i + jnp.sum(p, axis=-1, keepdims=True)
                acc = alpha * acc + jnp.einsum(
                    'bqk,bkd->bqd', p.astype(mm_dtype), vh,
                    preferred_element_type=jnp.float32)
                m_i = m_n
        if precise:
            ctx = acc / l_i
        else:
            ctx = acc * pl.reciprocal(l_i, approx=True)   # EUP slot
        ctx_s[:, :, q0:q0 + Dh] = ctx.astype(mm_dtype)

    attn = jnp.dot(ctx_s[...].reshape(R, E), wo_ref[...],
                   preferred_element_type=jnp.float32) + bo_ref[...]
    # TODO(synk): attention/MLP dropout is stochastic; identity here (eval mode).
    x = x + attn                                          # residual 1

    # ---- pre-LN 2 + chunked MLP (h1 never fully materialized).
    xn2 = _layernorm(x, ln2w_ref[...], ln2b_ref[...]).astype(mm_dtype)
    MLP = w1_ref.shape[1]
    num_mc = MLP // mlp_chunk
    h2 = None
    for c in range(num_mc):
        c0 = c * mlp_chunk
        h1 = jnp.dot(xn2, w1_ref[:, c0:c0 + mlp_chunk],
                     preferred_element_type=jnp.float32) + b1_ref[:, c0:c0 + mlp_chunk]
        # Strict path keeps nn.GELU's exact erf; fast path uses tanh (EUP slot).
        h1 = jax.nn.gelu(h1, approximate=not precise)
        part = jnp.dot(h1.astype(mm_dtype), w2_ref[c0:c0 + mlp_chunk, :],
                       preferred_element_type=jnp.float32)
        h2 = part if h2 is None else h2 + part

    out = x + h2 + b2_ref[...]                            # residual 2
    out_ref[...] = out.reshape(Bb, S, E).astype(out_ref.dtype)


def _largest_divisor_leq(n, cap):
    cap = max(1, min(cap, n))
    for d in range(cap, 0, -1):
        if n % d == 0:
            return d
    return n


def _vmem_capacity_bytes():
    try:
        info = pltpu.get_tpu_info()
        for name in ("vmem_capacity_bytes", "vmem_size_bytes", "vmem_bytes"):
            v = getattr(info, name, None)
            if v:
                return int(v)
    except Exception:
        pass
    return 64 * 1024 * 1024     # conservative fallback (v7x per-TensorCore)


def transformer_encoder(x, params, *, num_heads, batch_block=None,
                        matmul_dtype=jnp.bfloat16, precise=None,
                        kv_chunk=None, mlp_chunk=None,
                        single_buffer_weights=False):
    B, S, E = x.shape
    H = num_heads
    assert E % H == 0
    Dh = E // H
    MLP = params["w1"].shape[1]

    if precise is None:
        precise = np.dtype(matmul_dtype) == np.dtype(np.float32)

    # Host-side weight prep: fuse Q|K|V, fold 1/sqrt(Dh) into Q, cast to the MXU
    # operand dtype (bf16 default: native MXU rate, half the weight VMEM).
    scale = 1.0 / math.sqrt(Dh)
    wqkv = jnp.concatenate(
        [params["wq"] * scale, params["wk"], params["wv"]], axis=1).astype(matmul_dtype)
    bqkv = jnp.concatenate(
        [params["bq"] * scale, params["bk"], params["bv"]], axis=1).astype(jnp.float32)
    wo = params["wo"].astype(matmul_dtype)
    w1 = params["w1"].astype(matmul_dtype)
    w2 = params["w2"].astype(matmul_dtype)

    # Chunk sizes bounding the largest temporaries: (R, kv_chunk) scores and
    # (R, mlp_chunk) h1.
    if kv_chunk is None:
        kv_chunk = _largest_divisor_leq(S, 512)
    if mlp_chunk is None:
        mlp_chunk = _largest_divisor_leq(MLP, 1024)
    assert S % kv_chunk == 0 and MLP % mlp_chunk == 0

    # Generation-aware VMEM budgeting (v5e/v6e 128 MiB, v7x 64 MiB per core).
    mm_bytes = np.dtype(matmul_dtype).itemsize
    vmem_cap = _vmem_capacity_bytes()
    vmem_limit = int(vmem_cap * 0.8)     # ~102 MiB on v5e/v6e, ~51 MiB on v7x
    weight_bufs = 1 if single_buffer_weights else 2
    weight_bytes = weight_bufs * mm_bytes * int(
        wqkv.size + wo.size + w1.size + w2.size)

    def _activation_bytes(bb):
        r = bb * S
        io = 4 * bb * S * E * x.dtype.itemsize        # x in + out, double-buffered
        scratch = r * 4 * E * mm_bytes                # qkv (3E) + ctx (E) scratch
        live = 6 * r * E * 4                          # f32 row-matrix working set
        live += 2 * r * max(kv_chunk, mlp_chunk) * 4  # scores / h1 chunk
        return io + scratch + live

    if batch_block is None:
        budget = vmem_limit - weight_bytes - (2 << 20)
        divisors = [d for d in range(1, B + 1) if B % d == 0]
        fit = [d for d in divisors if _activation_bytes(d) <= budget]
        batch_block = 1
        if fit:
            # Prefer >= 4 grid steps (>= 2 pipelined steps per TensorCore), then
            # >= 2 (megacore), then the largest block that fits VMEM.
            for target in (4, 2, 1):
                pref = [d for d in fit if B // d >= target]
                if pref:
                    batch_block = max(pref)
                    break
    assert B % batch_block == 0
    grid_b = B // batch_block

    args = (x, wqkv, bqkv, wo, params["bo"],
            params["ln1w"], params["ln1b"], params["ln2w"], params["ln2b"],
            w1, params["b1"], w2, params["b2"])

    def _const_spec(a):
        n = a.ndim
        if single_buffer_weights:
            # Constant-index weight blocks don't need double-buffering; halves
            # weight VMEM (essential at real sizes on v7x).  Opt-in.
            return pl.BlockSpec(a.shape, lambda b, _n=n: (0,) * _n,
                                pipeline_mode=pl.Buffered(1))
        return pl.BlockSpec(a.shape, lambda b, _n=n: (0,) * _n)

    in_specs = [pl.BlockSpec((batch_block, S, E), lambda b: (b, 0, 0))]
    in_specs += [_const_spec(a) for a in args[1:]]

    flops = 2 * B * S * (4 * E * E + 2 * E * MLP) + 4 * B * S * S * E
    transcendentals = B * H * S * S + B * S * MLP + 2 * B * S
    # Weights have constant index maps -> fetched once, not per grid step.
    bytes_accessed = 2 * x.size * x.dtype.itemsize + sum(
        int(a.size) * a.dtype.itemsize for a in args[1:])

    kern = functools.partial(transformer_encoder_kernel,
                             num_heads, kv_chunk, mlp_chunk, precise)

    return pl.pallas_call(
        kern,
        out_shape=jax.ShapeDtypeStruct((B, S, E), x.dtype),
        grid=(grid_b,),
        in_specs=in_specs,
        out_specs=pl.BlockSpec((batch_block, S, E), lambda b: (b, 0, 0)),
        scratch_shapes=[pltpu.VMEM((batch_block, S, 3 * E), matmul_dtype),
                        pltpu.VMEM((batch_block, S, E), matmul_dtype)],
        compiler_params=pltpu.CompilerParams(
            dimension_semantics=("parallel",),
            vmem_limit_bytes=vmem_limit,
        ),
        cost_estimate=pl.CostEstimate(
            flops=int(flops), transcendentals=int(transcendentals),
            bytes_accessed=int(bytes_accessed)),
    )(*args)


def reference(x, params, num_heads):
    """Pure-JAX reference for the same math (eval mode)."""
    def ln(t, w, b):
        mean = jnp.mean(t, -1, keepdims=True)
        var = jnp.mean((t - mean) ** 2, -1, keepdims=True)
        return (t - mean) / jnp.sqrt(var + EPS) * w + b

    B, S, E = x.shape
    H = num_heads
    Dh = E // H
    xn = ln(x, params["ln1w"][0], params["ln1b"][0])
    q = xn @ params["wq"] + params["bq"][0]
    k = xn @ params["wk"] + params["bk"][0]
    v = xn @ params["wv"] + params["bv"][0]
    q = q.reshape(B, S, H, Dh).transpose(0, 2, 1, 3)
    k = k.reshape(B, S, H, Dh).transpose(0, 2, 1, 3)
    v = v.reshape(B, S, H, Dh).transpose(0, 2, 1, 3)
    s = jnp.einsum("bhqd,bhkd->bhqk", q, k) / math.sqrt(Dh)
    p = jax.nn.softmax(s, axis=-1)
    a = jnp.einsum("bhqk,bhkd->bhqd", p, v).transpose(0, 2, 1, 3).reshape(B, S, E)
    a = a @ params["wo"] + params["bo"][0]
    x = x + a
    xn2 = ln(x, params["ln2w"][0], params["ln2b"][0])
    h = jax.nn.gelu(xn2 @ params["w1"] + params["b1"][0], approximate=False)
    h = h @ params["w2"] + params["b2"][0]
    return x + h


if __name__ == "__main__":
    def make_case(B, S, E, H, MLP):
        key = jax.random.PRNGKey(0)
        keys = jax.random.split(key, 12)

        def w(k, shape):
            return jax.random.normal(k, shape, jnp.float32) * 0.02

        # Weights stored as (in, out): kernel computes x @ W + b, equivalent to
        # PyTorch's x @ W_pt.T + b with W_pt = W.T.
        params = dict(
            wq=w(keys[0], (E, E)), wk=w(keys[1], (E, E)), wv=w(keys[2], (E, E)),
            bq=w(keys[3], (1, E)), bk=w(keys[4], (1, E)), bv=w(keys[5], (1, E)),
            wo=w(keys[6], (E, E)), bo=w(keys[7], (1, E)),
            ln1w=jnp.ones((1, E), jnp.float32), ln1b=jnp.zeros((1, E), jnp.float32),
            ln2w=jnp.ones((1, E), jnp.float32), ln2b=jnp.zeros((1, E), jnp.float32),
            w1=w(keys[8], (E, MLP)), b1=w(keys[9], (1, MLP)),
            w2=w(keys[10], (MLP, E)), b2=jnp.zeros((1, E), jnp.float32),
        )
        x = jax.random.normal(keys[11], (B, S, E), jnp.float32)
        return x, params

    def run_case(B, S, E, H, MLP):
        x, params = make_case(B, S, E, H, MLP)
        ref = reference(x, params, H)

        # Default fast path: bf16 MXU operands, tanh GELU, approx reciprocal.
        out = jax.block_until_ready(transformer_encoder(x, params, num_heads=H))
        assert out.shape == (B, S, E) and out.dtype == jnp.float32
        assert jnp.allclose(out, ref, atol=2e-2, rtol=2e-2), \
            f"bf16 path mismatch (B={B},S={S},E={E},H={H},MLP={MLP})"

        # Strict-parity path: f32 operands, exact erf GELU, exact softmax divide.
        out32 = jax.block_until_ready(
            transformer_encoder(x, params, num_heads=H, matmul_dtype=jnp.float32))
        assert jnp.allclose(out32, ref, atol=5e-4, rtol=5e-4), \
            f"f32 path mismatch (B={B},S={S},E={E},H={H},MLP={MLP})"

    # Toy config (batch_block=1, grid=(2,)).
    run_case(B=2, S=8, E=32, H=4, MLP=64)
    # Lane-dense config: E is a multiple of 128 (unmasked output vst), grid=(4,).
    run_case(B=4, S=8, E=128, H=4, MLP=256)

    print("KERNEL_OK")
</pallas_src>

<mosaic_0001>
module attributes {stable_mosaic.version = 11 : i64} {
  func.func @transformer_encoder_kernel(%arg0: i32, %arg1: memref<1x8x32xf32, #tpu.memory_space<vmem>>, %arg2: memref<32x96xbf16, #tpu.memory_space<vmem>>, %arg3: memref<1x96xf32, #tpu.memory_space<vmem>>, %arg4: memref<32x32xbf16, #tpu.memory_space<vmem>>, %arg5: memref<1x32xf32, #tpu.memory_space<vmem>>, %arg6: memref<1x32xf32, #tpu.memory_space<vmem>>, %arg7: memref<1x32xf32, #tpu.memory_space<vmem>>, %arg8: memref<1x32xf32, #tpu.memory_space<vmem>>, %arg9: memref<1x32xf32, #tpu.memory_space<vmem>>, %arg10: memref<32x64xbf16, #tpu.memory_space<vmem>>, %arg11: memref<1x64xf32, #tpu.memory_space<vmem>>, %arg12: memref<64x32xbf16, #tpu.memory_space<vmem>>, %arg13: memref<1x32xf32, #tpu.memory_space<vmem>>, %arg14: memref<1x8x32xf32, #tpu.memory_space<vmem>>, %arg15: memref<1x8x96xbf16, #tpu.memory_space<vmem>>, %arg16: memref<1x8x32xbf16, #tpu.memory_space<vmem>>) attributes {dimension_semantics = [#tpu.dimension_semantics<parallel>], iteration_bounds = array<i64: 2>, scalar_prefetch = 0 : i64, scratch_operands = 2 : i64, tpu.core_type = #tpu.core_type<tc>, window_params = [{transform_indices = @transform_0, window_bounds = array<i64: 1, 8, 32>}, {pipeline_mode = #tpu.pipeline_mode<synchronous>, transform_indices = @transform_1, window_bounds = array<i64: 32, 96>}, {pipeline_mode = #tpu.pipeline_mode<synchronous>, transform_indices = @transform_2, window_bounds = array<i64: 1, 96>}, {pipeline_mode = #tpu.pipeline_mode<synchronous>, transform_indices = @transform_3, window_bounds = array<i64: 32, 32>}, {pipeline_mode = #tpu.pipeline_mode<synchronous>, transform_indices = @transform_4, window_bounds = array<i64: 1, 32>}, {pipeline_mode = #tpu.pipeline_mode<synchronous>, transform_indices = @transform_5, window_bounds = array<i64: 1, 32>}, {pipeline_mode = #tpu.pipeline_mode<synchronous>, transform_indices = @transform_6, window_bounds = array<i64: 1, 32>}, {pipeline_mode = #tpu.pipeline_mode<synchronous>, transform_indices = @transform_7, window_bounds = array<i64: 1, 32>}, {pipeline_mode = #tpu.pipeline_mode<synchronous>, transform_indices = @transform_8, window_bounds = array<i64: 1, 32>}, {pipeline_mode = #tpu.pipeline_mode<synchronous>, transform_indices = @transform_9, window_bounds = array<i64: 32, 64>}, {pipeline_mode = #tpu.pipeline_mode<synchronous>, transform_indices = @transform_10, window_bounds = array<i64: 1, 64>}, {pipeline_mode = #tpu.pipeline_mode<synchronous>, transform_indices = @transform_11, window_bounds = array<i64: 64, 32>}, {pipeline_mode = #tpu.pipeline_mode<synchronous>, transform_indices = @transform_12, window_bounds = array<i64: 1, 32>}, {transform_indices = @transform_13, window_bounds = array<i64: 1, 8, 32>}]} {
    %c0 = arith.constant 0 : index
    %c0_0 = arith.constant 0 : index
    %c0_1 = arith.constant 0 : index
    %0 = vector.load %arg1[%c0, %c0_0, %c0_1] : memref<1x8x32xf32, #tpu.memory_space<vmem>>, vector<1x8x32xf32>
    %1 = vector.shape_cast %0 : vector<1x8x32xf32> to vector<8x32xf32>
    %c0_2 = arith.constant 0 : index
    %c0_3 = arith.constant 0 : index
    %2 = vector.load %arg6[%c0_2, %c0_3] : memref<1x32xf32, #tpu.memory_space<vmem>>, vector<1x32xf32>
    %c0_4 = arith.constant 0 : index
    %c0_5 = arith.constant 0 : index
    %3 = vector.load %arg7[%c0_4, %c0_5] : memref<1x32xf32, #tpu.memory_space<vmem>>, vector<1x32xf32>
    %cst = arith.constant dense<0.000000e+00> : vector<8xf32>
    %4 = vector.multi_reduction <add>, %1, %cst [1] : vector<8x32xf32> to vector<8xf32>
    %5 = vector.shape_cast %4 : vector<8xf32> to vector<8x1xf32>
    %cst_6 = arith.constant 3.200000e+01 : f32
    %6 = vector.broadcast %cst_6 : f32 to vector<8x1xf32>
    %7 = arith.divf %5, %6 : vector<8x1xf32>
    %8 = vector.broadcast %7 : vector<8x1xf32> to vector<8x32xf32>
    %9 = arith.subf %1, %8 : vector<8x32xf32>
    %10 = arith.mulf %9, %9 : vector<8x32xf32>
    %cst_7 = arith.constant dense<0.000000e+00> : vector<8xf32>
    %11 = vector.multi_reduction <add>, %10, %cst_7 [1] : vector<8x32xf32> to vector<8xf32>
    %12 = vector.shape_cast %11 : vector<8xf32> to vector<8x1xf32>
    %cst_8 = arith.constant 3.200000e+01 : f32
    %13 = vector.broadcast %cst_8 : f32 to vector<8x1xf32>
    %14 = arith.divf %12, %13 : vector<8x1xf32>
    %cst_9 = arith.constant 9.99999974E-6 : f32
    %15 = vector.broadcast %cst_9 : f32 to vector<8x1xf32>
    %16 = arith.addf %14, %15 : vector<8x1xf32>
    %17 = math.rsqrt %16 : vector<8x1xf32>
    %18 = vector.broadcast %17 : vector<8x1xf32> to vector<8x32xf32>
    %19 = arith.mulf %9, %18 : vector<8x32xf32>
    %20 = vector.broadcast %2 : vector<1x32xf32> to vector<8x32xf32>
    %21 = arith.mulf %19, %20 : vector<8x32xf32>
    %22 = vector.broadcast %3 : vector<1x32xf32> to vector<8x32xf32>
    %23 = arith.addf %21, %22 : vector<8x32xf32>
    %24 = arith.truncf %23 : vector<8x32xf32> to vector<8x32xbf16>
    %c0_10 = arith.constant 0 : index
    %c0_11 = arith.constant 0 : index
    %25 = vector.load %arg2[%c0_10, %c0_11] : memref<32x96xbf16, #tpu.memory_space<vmem>>, vector<32x96xbf16>
    %cst_12 = arith.constant dense<0.000000e+00> : vector<8x96xf32>
    %26 = tpu.matmul %24, %25, %cst_12 {dimension_numbers = #tpu.dot_dimension_numbers<[1], [0], [0], [1], [0, 0, 1, 1], [], []>} : vector<8x32xbf16>, vector<32x96xbf16>, vector<8x96xf32> -> vector<8x96xf32>
    %c0_13 = arith.constant 0 : index
    %c0_14 = arith.constant 0 : index
    %27 = vector.load %arg3[%c0_13, %c0_14] : memref<1x96xf32, #tpu.memory_space<vmem>>, vector<1x96xf32>
    %28 = vector.broadcast %27 : vector<1x96xf32> to vector<8x96xf32>
    %29 = arith.addf %26, %28 : vector<8x96xf32>
    %30 = vector.shape_cast %29 : vector<8x96xf32> to vector<1x8x96xf32>
    %31 = arith.truncf %30 : vector<1x8x96xf32> to vector<1x8x96xbf16>
    %c0_15 = arith.constant 0 : index
    %c0_16 = arith.constant 0 : index
    %c0_17 = arith.constant 0 : index
    %32 = vector.load %arg15[%c0_15, %c0_16, %c0_17] : memref<1x8x96xbf16, #tpu.memory_space<vmem>>, vector<1x8x96xbf16>
    tpu.vector_store %arg15[%c0_15, %c0_16, %c0_17], %31 {strides = array<i32>} : memref<1x8x96xbf16, #tpu.memory_space<vmem>>, vector<1x8x96xbf16>,
    %c0_18 = arith.constant 0 : index
    %c0_19 = arith.constant 0 : index
    %c0_20 = arith.constant 0 : index
    %33 = vector.load %arg15[%c0_18, %c0_19, %c0_20] : memref<1x8x96xbf16, #tpu.memory_space<vmem>>, vector<1x8x8xbf16>
    %c0_21 = arith.constant 0 : index
    %c0_22 = arith.constant 0 : index
    %c32 = arith.constant 32 : index
    %34 = vector.load %arg15[%c0_21, %c0_22, %c32] : memref<1x8x96xbf16, #tpu.memory_space<vmem>>, vector<1x8x8xbf16>
    %c0_23 = arith.constant 0 : index
    %c0_24 = arith.constant 0 : index
    %c64 = arith.constant 64 : index
    %35 = vector.load %arg15[%c0_23, %c0_24, %c64] : memref<1x8x96xbf16, #tpu.memory_space<vmem>>, vector<1x8x8xbf16>
    "tpu.trace_start"() <{level = 10 : i32, message = "bqd,bkd->bqk"}> : () -> ()
    %cst_25 = arith.constant dense<0.000000e+00> : vector<1x8x8xf32>
    %36 = tpu.matmul %33, %34, %cst_25 {dimension_numbers = #tpu.dot_dimension_numbers<[2], [2], [1], [1], [0, 0, 0, 1, 1, 1], [0], [0]>} : vector<1x8x8xbf16>, vector<1x8x8xbf16>, vector<1x8x8xf32> -> vector<1x8x8xf32>
    "tpu.trace_stop"() : () -> ()
    %cst_26 = arith.constant dense<0xFF800000> : vector<1x8xf32>
    %37 = vector.multi_reduction <maximumf>, %36, %cst_26 [2] : vector<1x8x8xf32> to vector<1x8xf32>
    %38 = vector.shape_cast %37 : vector<1x8xf32> to vector<1x8x1xf32>
    %39 = vector.broadcast %38 : vector<1x8x1xf32> to vector<1x8x8xf32>
    %40 = arith.subf %36, %39 : vector<1x8x8xf32>
    %41 = math.exp %40 : vector<1x8x8xf32>
    %cst_27 = arith.constant dense<0.000000e+00> : vector<1x8xf32>
    %42 = vector.multi_reduction <add>, %41, %cst_27 [2] : vector<1x8x8xf32> to vector<1x8xf32>
    %43 = vector.shape_cast %42 : vector<1x8xf32> to vector<1x8x1xf32>
    %44 = arith.truncf %41 : vector<1x8x8xf32> to vector<1x8x8xbf16>
    "tpu.trace_start"() <{level = 10 : i32, message = "bqk,bkd->bqd"}> : () -> ()
    %cst_28 = arith.constant dense<0.000000e+00> : vector<1x8x8xf32>
    %45 = tpu.matmul %44, %35, %cst_28 {dimension_numbers = #tpu.dot_dimension_numbers<[2], [1], [1], [2], [0, 0, 0, 1, 1, 2], [0], [0]>} : vector<1x8x8xbf16>, vector<1x8x8xbf16>, vector<1x8x8xf32> -> vector<1x8x8xf32>
    "tpu.trace_stop"() : () -> ()
    %46 = tpu.reciprocal %43 {approx = true} : vector<1x8x1xf32> -> vector<1x8x1xf32>
    %47 = vector.broadcast %46 : vector<1x8x1xf32> to vector<1x8x8xf32>
    %48 = arith.mulf %45, %47 : vector<1x8x8xf32>
    %49 = arith.truncf %48 : vector<1x8x8xf32> to vector<1x8x8xbf16>
    %c0_29 = arith.constant 0 : index
    %c0_30 = arith.constant 0 : index
    %c0_31 = arith.constant 0 : index
    %50 = vector.load %arg16[%c0_29, %c0_30, %c0_31] : memref<1x8x32xbf16, #tpu.memory_space<vmem>>, vector<1x8x8xbf16>
    tpu.vector_store %arg16[%c0_29, %c0_30, %c0_31], %49 {strides = array<i32>} : memref<1x8x32xbf16, #tpu.memory_space<vmem>>, vector<1x8x8xbf16>,
    %c0_32 = arith.constant 0 : index
    %c0_33 = arith.constant 0 : index
    %c8 = arith.constant 8 : index
    %51 = vector.load %arg15[%c0_32, %c0_33, %c8] : memref<1x8x96xbf16, #tpu.memory_space<vmem>>, vector<1x8x8xbf16>
    %c0_34 = arith.constant 0 : index
    %c0_35 = arith.constant 0 : index
    %c40 = arith.constant 40 : index
    %52 = vector.load %arg15[%c0_34, %c0_35, %c40] : memref<1x8x96xbf16, #tpu.memory_space<vmem>>, vector<1x8x8xbf16>
    %c0_36 = arith.constant 0 : index
    %c0_37 = arith.constant 0 : index
    %c72 = arith.constant 72 : index
    %53 = vector.load %arg15[%c0_36, %c0_37, %c72] : memref<1x8x96xbf16, #tpu.memory_space<vmem>>, vector<1x8x8xbf16>
    "tpu.trace_start"() <{level = 10 : i32, message = "bqd,bkd->bqk"}> : () -> ()
    %cst_38 = arith.constant dense<0.000000e+00> : vector<1x8x8xf32>
    %54 = tpu.matmul %51, %52, %cst_38 {dimension_numbers = #tpu.dot_dimension_numbers<[2], [2], [1], [1], [0, 0, 0, 1, 1, 1], [0], [0]>} : vector<1x8x8xbf16>, vector<1x8x8xbf16>, vector<1x8x8xf32> -> vector<1x8x8xf32>
    "tpu.trace_stop"() : () -> ()
    %cst_39 = arith.constant dense<0xFF800000> : vector<1x8xf32>
    %55 = vector.multi_reduction <maximumf>, %54, %cst_39 [2] : vector<1x8x8xf32> to vector<1x8xf32>
    %56 = vector.shape_cast %55 : vector<1x8xf32> to vector<1x8x1xf32>
    %57 = vector.broadcast %56 : vector<1x8x1xf32> to vector<1x8x8xf32>
    %58 = arith.subf %54, %57 : vector<1x8x8xf32>
    %59 = math.exp %58 : vector<1x8x8xf32>
    %cst_40 = arith.constant dense<0.000000e+00> : vector<1x8xf32>
    %60 = vector.multi_reduction <add>, %59, %cst_40 [2] : vector<1x8x8xf32> to vector<1x8xf32>
    %61 = vector.shape_cast %60 : vector<1x8xf32> to vector<1x8x1xf32>
    %62 = arith.truncf %59 : vector<1x8x8xf32> to vector<1x8x8xbf16>
    "tpu.trace_start"() <{level = 10 : i32, message = "bqk,bkd->bqd"}> : () -> ()
    %cst_41 = arith.constant dense<0.000000e+00> : vector<1x8x8xf32>
    %63 = tpu.matmul %62, %53, %cst_41 {dimension_numbers = #tpu.dot_dimension_numbers<[2], [1], [1], [2], [0, 0, 0, 1, 1, 2], [0], [0]>} : vector<1x8x8xbf16>, vector<1x8x8xbf16>, vector<1x8x8xf32> -> vector<1x8x8xf32>
    "tpu.trace_stop"() : () -> ()
    %64 = tpu.reciprocal %61 {approx = true} : vector<1x8x1xf32> -> vector<1x8x1xf32>
    %65 = vector.broadcast %64 : vector<1x8x1xf32> to vector<1x8x8xf32>
    %66 = arith.mulf %63, %65 : vector<1x8x8xf32>
    %67 = arith.truncf %66 : vector<1x8x8xf32> to vector<1x8x8xbf16>
    %c0_42 = arith.constant 0 : index
    %c0_43 = arith.constant 0 : index
    %c8_44 = arith.constant 8 : index
    %68 = vector.load %arg16[%c0_42, %c0_43, %c8_44] : memref<1x8x32xbf16, #tpu.memory_space<vmem>>, vector<1x8x8xbf16>
    tpu.vector_store %arg16[%c0_42, %c0_43, %c8_44], %67 {strides = array<i32>} : memref<1x8x32xbf16, #tpu.memory_space<vmem>>, vector<1x8x8xbf16>,
    %c0_45 = arith.constant 0 : index
    %c0_46 = arith.constant 0 : index
    %c16 = arith.constant 16 : index
    %69 = vector.load %arg15[%c0_45, %c0_46, %c16] : memref<1x8x96xbf16, #tpu.memory_space<vmem>>, vector<1x8x8xbf16>
    %c0_47 = arith.constant 0 : index
    %c0_48 = arith.constant 0 : index
    %c48 = arith.constant 48 : index
    %70 = vector.load %arg15[%c0_47, %c0_48, %c48] : memref<1x8x96xbf16, #tpu.memory_space<vmem>>, vector<1x8x8xbf16>
    %c0_49 = arith.constant 0 : index
    %c0_50 = arith.constant 0 : index
    %c80 = arith.constant 80 : index
    %71 = vector.load %arg15[%c0_49, %c0_50, %c80] : memref<1x8x96xbf16, #tpu.memory_space<vmem>>, vector<1x8x8xbf16>
    "tpu.trace_start"() <{level = 10 : i32, message = "bqd,bkd->bqk"}> : () -> ()
    %cst_51 = arith.constant dense<0.000000e+00> : vector<1x8x8xf32>
    %72 = tpu.matmul %69, %70, %cst_51 {dimension_numbers = #tpu.dot_dimension_numbers<[2], [2], [1], [1], [0, 0, 0, 1, 1, 1], [0], [0]>} : vector<1x8x8xbf16>, vector<1x8x8xbf16>, vector<1x8x8xf32> -> vector<1x8x8xf32>
    "tpu.trace_stop"() : () -> ()
    %cst_52 = arith.constant dense<0xFF800000> : vector<1x8xf32>
    %73 = vector.multi_reduction <maximumf>, %72, %cst_52 [2] : vector<1x8x8xf32> to vector<1x8xf32>
    %74 = vector.shape_cast %73 : vector<1x8xf32> to vector<1x8x1xf32>
    %75 = vector.broadcast %74 : vector<1x8x1xf32> to vector<1x8x8xf32>
    %76 = arith.subf %72, %75 : vector<1x8x8xf32>
    %77 = math.exp %76 : vector<1x8x8xf32>
    %cst_53 = arith.constant dense<0.000000e+00> : vector<1x8xf32>
    %78 = vector.multi_reduction <add>, %77, %cst_53 [2] : vector<1x8x8xf32> to vector<1x8xf32>
    %79 = vector.shape_cast %78 : vector<1x8xf32> to vector<1x8x1xf32>
    %80 = arith.truncf %77 : vector<1x8x8xf32> to vector<1x8x8xbf16>
    "tpu.trace_start"() <{level = 10 : i32, message = "bqk,bkd->bqd"}> : () -> ()
    %cst_54 = arith.constant dense<0.000000e+00> : vector<1x8x8xf32>
    %81 = tpu.matmul %80, %71, %cst_54 {dimension_numbers = #tpu.dot_dimension_numbers<[2], [1], [1], [2], [0, 0, 0, 1, 1, 2], [0], [0]>} : vector<1x8x8xbf16>, vector<1x8x8xbf16>, vector<1x8x8xf32> -> vector<1x8x8xf32>
    "tpu.trace_stop"() : () -> ()
    %82 = tpu.reciprocal %79 {approx = true} : vector<1x8x1xf32> -> vector<1x8x1xf32>
    %83 = vector.broadcast %82 : vector<1x8x1xf32> to vector<1x8x8xf32>
    %84 = arith.mulf %81, %83 : vector<1x8x8xf32>
    %85 = arith.truncf %84 : vector<1x8x8xf32> to vector<1x8x8xbf16>
    %c0_55 = arith.constant 0 : index
    %c0_56 = arith.constant 0 : index
    %c16_57 = arith.constant 16 : index
    %86 = vector.load %arg16[%c0_55, %c0_56, %c16_57] : memref<1x8x32xbf16, #tpu.memory_space<vmem>>, vector<1x8x8xbf16>
    tpu.vector_store %arg16[%c0_55, %c0_56, %c16_57], %85 {strides = array<i32>} : memref<1x8x32xbf16, #tpu.memory_space<vmem>>, vector<1x8x8xbf16>,
    %c0_58 = arith.constant 0 : index
    %c0_59 = arith.constant 0 : index
    %c24 = arith.constant 24 : index
    %87 = vector.load %arg15[%c0_58, %c0_59, %c24] : memref<1x8x96xbf16, #tpu.memory_space<vmem>>, vector<1x8x8xbf16>
    %c0_60 = arith.constant 0 : index
    %c0_61 = arith.constant 0 : index
    %c56 = arith.constant 56 : index
    %88 = vector.load %arg15[%c0_60, %c0_61, %c56] : memref<1x8x96xbf16, #tpu.memory_space<vmem>>, vector<1x8x8xbf16>
    %c0_62 = arith.constant 0 : index
    %c0_63 = arith.constant 0 : index
    %c88 = arith.constant 88 : index
    %89 = vector.load %arg15[%c0_62, %c0_63, %c88] : memref<1x8x96xbf16, #tpu.memory_space<vmem>>, vector<1x8x8xbf16>
    "tpu.trace_start"() <{level = 10 : i32, message = "bqd,bkd->bqk"}> : () -> ()
    %cst_64 = arith.constant dense<0.000000e+00> : vector<1x8x8xf32>
    %90 = tpu.matmul %87, %88, %cst_64 {dimension_numbers = #tpu.dot_dimension_numbers<[2], [2], [1], [1], [0, 0, 0, 1, 1, 1], [0], [0]>} : vector<1x8x8xbf16>, vector<1x8x8xbf16>, vector<1x8x8xf32> -> vector<1x8x8xf32>
    "tpu.trace_stop"() : () -> ()
    %cst_65 = arith.constant dense<0xFF800000> : vector<1x8xf32>
    %91 = vector.multi_reduction <maximumf>, %90, %cst_65 [2] : vector<1x8x8xf32> to vector<1x8xf32>
    %92 = vector.shape_cast %91 : vector<1x8xf32> to vector<1x8x1xf32>
    %93 = vector.broadcast %92 : vector<1x8x1xf32> to vector<1x8x8xf32>
    %94 = arith.subf %90, %93 : vector<1x8x8xf32>
    %95 = math.exp %94 : vector<1x8x8xf32>
    %cst_66 = arith.constant dense<0.000000e+00> : vector<1x8xf32>
    %96 = vector.multi_reduction <add>, %95, %cst_66 [2] : vector<1x8x8xf32> to vector<1x8xf32>
    %97 = vector.shape_cast %96 : vector<1x8xf32> to vector<1x8x1xf32>
    %98 = arith.truncf %95 : vector<1x8x8xf32> to vector<1x8x8xbf16>
    "tpu.trace_start"() <{level = 10 : i32, message = "bqk,bkd->bqd"}> : () -> ()
    %cst_67 = arith.constant dense<0.000000e+00> : vector<1x8x8xf32>
    %99 = tpu.matmul %98, %89, %cst_67 {dimension_numbers = #tpu.dot_dimension_numbers<[2], [1], [1], [2], [0, 0, 0, 1, 1, 2], [0], [0]>} : vector<1x8x8xbf16>, vector<1x8x8xbf16>, vector<1x8x8xf32> -> vector<1x8x8xf32>
    "tpu.trace_stop"() : () -> ()
    %100 = tpu.reciprocal %97 {approx = true} : vector<1x8x1xf32> -> vector<1x8x1xf32>
    %101 = vector.broadcast %100 : vector<1x8x1xf32> to vector<1x8x8xf32>
    %102 = arith.mulf %99, %101 : vector<1x8x8xf32>
    %103 = arith.truncf %102 : vector<1x8x8xf32> to vector<1x8x8xbf16>
    %c0_68 = arith.constant 0 : index
    %c0_69 = arith.constant 0 : index
    %c24_70 = arith.constant 24 : index
    %104 = vector.load %arg16[%c0_68, %c0_69, %c24_70] : memref<1x8x32xbf16, #tpu.memory_space<vmem>>, vector<1x8x8xbf16>
    tpu.vector_store %arg16[%c0_68, %c0_69, %c24_70], %103 {strides = array<i32>} : memref<1x8x32xbf16, #tpu.memory_space<vmem>>, vector<1x8x8xbf16>,
    %c0_71 = arith.constant 0 : index
    %c0_72 = arith.constant 0 : index
    %c0_73 = arith.constant 0 : index
    %105 = vector.load %arg16[%c0_71, %c0_72, %c0_73] : memref<1x8x32xbf16, #tpu.memory_space<vmem>>, vector<1x8x32xbf16>
    %106 = vector.shape_cast %105 : vector<1x8x32xbf16> to vector<8x32xbf16>
    %c0_74 = arith.constant 0 : index
    %c0_75 = arith.constant 0 : index
    %107 = vector.load %arg4[%c0_74, %c0_75] : memref<32x32xbf16, #tpu.memory_space<vmem>>, vector<32x32xbf16>
    %cst_76 = arith.constant dense<0.000000e+00> : vector<8x32xf32>
    %108 = tpu.matmul %106, %107, %cst_76 {dimension_numbers = #tpu.dot_dimension_numbers<[1], [0], [0], [1], [0, 0, 1, 1], [], []>} : vector<8x32xbf16>, vector<32x32xbf16>, vector<8x32xf32> -> vector<8x32xf32>
    %c0_77 = arith.constant 0 : index
    %c0_78 = arith.constant 0 : index
    %109 = vector.load %arg5[%c0_77, %c0_78] : memref<1x32xf32, #tpu.memory_space<vmem>>, vector<1x32xf32>
    %110 = vector.broadcast %109 : vector<1x32xf32> to vector<8x32xf32>
    %111 = arith.addf %108, %110 : vector<8x32xf32>
    %112 = arith.addf %1, %111 : vector<8x32xf32>
    %c0_79 = arith.constant 0 : index
    %c0_80 = arith.constant 0 : index
    %113 = vector.load %arg8[%c0_79, %c0_80] : memref<1x32xf32, #tpu.memory_space<vmem>>, vector<1x32xf32>
    %c0_81 = arith.constant 0 : index
    %c0_82 = arith.constant 0 : index
    %114 = vector.load %arg9[%c0_81, %c0_82] : memref<1x32xf32, #tpu.memory_space<vmem>>, vector<1x32xf32>
    %cst_83 = arith.constant dense<0.000000e+00> : vector<8xf32>
    %115 = vector.multi_reduction <add>, %112, %cst_83 [1] : vector<8x32xf32> to vector<8xf32>
    %116 = vector.shape_cast %115 : vector<8xf32> to vector<8x1xf32>
    %cst_84 = arith.constant 3.200000e+01 : f32
    %117 = vector.broadcast %cst_84 : f32 to vector<8x1xf32>
    %118 = arith.divf %116, %117 : vector<8x1xf32>
    %119 = vector.broadcast %118 : vector<8x1xf32> to vector<8x32xf32>
    %120 = arith.subf %112, %119 : vector<8x32xf32>
    %121 = arith.mulf %120, %120 : vector<8x32xf32>
    %cst_85 = arith.constant dense<0.000000e+00> : vector<8xf32>
    %122 = vector.multi_reduction <add>, %121, %cst_85 [1] : vector<8x32xf32> to vector<8xf32>
    %123 = vector.shape_cast %122 : vector<8xf32> to vector<8x1xf32>
    %cst_86 = arith.constant 3.200000e+01 : f32
    %124 = vector.broadcast %cst_86 : f32 to vector<8x1xf32>
    %125 = arith.divf %123, %124 : vector<8x1xf32>
    %cst_87 = arith.constant 9.99999974E-6 : f32
    %126 = vector.broadcast %cst_87 : f32 to vector<8x1xf32>
    %127 = arith.addf %125, %126 : vector<8x1xf32>
    %128 = math.rsqrt %127 : vector<8x1xf32>
    %129 = vector.broadcast %128 : vector<8x1xf32> to vector<8x32xf32>
    %130 = arith.mulf %120, %129 : vector<8x32xf32>
    %131 = vector.broadcast %113 : vector<1x32xf32> to vector<8x32xf32>
    %132 = arith.mulf %130, %131 : vector<8x32xf32>
    %133 = vector.broadcast %114 : vector<1x32xf32> to vector<8x32xf32>
    %134 = arith.addf %132, %133 : vector<8x32xf32>
    %135 = arith.truncf %134 : vector<8x32xf32> to vector<8x32xbf16>
    %c0_88 = arith.constant 0 : index
    %c0_89 = arith.constant 0 : index
    %136 = vector.load %arg10[%c0_88, %c0_89] : memref<32x64xbf16, #tpu.memory_space<vmem>>, vector<32x64xbf16>
    %cst_90 = arith.constant dense<0.000000e+00> : vector<8x64xf32>
    %137 = tpu.matmul %135, %136, %cst_90 {dimension_numbers = #tpu.dot_dimension_numbers<[1], [0], [0], [1], [0, 0, 1, 1], [], []>} : vector<8x32xbf16>, vector<32x64xbf16>, vector<8x64xf32> -> vector<8x64xf32>
    %c0_91 = arith.constant 0 : index
    %c0_92 = arith.constant 0 : index
    %138 = vector.load %arg11[%c0_91, %c0_92] : memref<1x64xf32, #tpu.memory_space<vmem>>, vector<1x64xf32>
    %139 = vector.broadcast %138 : vector<1x64xf32> to vector<8x64xf32>
    %140 = arith.addf %137, %139 : vector<8x64xf32>
    %141 = arith.mulf %140, %140 : vector<8x64xf32>
    %142 = arith.mulf %140, %141 : vector<8x64xf32>
    %cst_93 = arith.constant 4.471500e-02 : f32
    %143 = vector.broadcast %cst_93 : f32 to vector<8x64xf32>
    %144 = arith.mulf %143, %142 : vector<8x64xf32>
    %145 = arith.addf %140, %144 : vector<8x64xf32>
    %cst_94 = arith.constant 0.797884583 : f32
    %146 = vector.broadcast %cst_94 : f32 to vector<8x64xf32>
    %147 = arith.mulf %146, %145 : vector<8x64xf32>
    %148 = math.tanh %147 : vector<8x64xf32>
    %cst_95 = arith.constant 1.000000e+00 : f32
    %149 = vector.broadcast %cst_95 : f32 to vector<8x64xf32>
    %150 = arith.addf %149, %148 : vector<8x64xf32>
    %cst_96 = arith.constant 5.000000e-01 : f32
    %151 = vector.broadcast %cst_96 : f32 to vector<8x64xf32>
    %152 = arith.mulf %151, %150 : vector<8x64xf32>
    %153 = arith.mulf %140, %152 : vector<8x64xf32>
    %154 = arith.truncf %153 : vector<8x64xf32> to vector<8x64xbf16>
    %c0_97 = arith.constant 0 : index
    %c0_98 = arith.constant 0 : index
    %155 = vector.load %arg12[%c0_97, %c0_98] : memref<64x32xbf16, #tpu.memory_space<vmem>>, vector<64x32xbf16>
    %cst_99 = arith.constant dense<0.000000e+00> : vector<8x32xf32>
    %156 = tpu.matmul %154, %155, %cst_99 {dimension_numbers = #tpu.dot_dimension_numbers<[1], [0], [0], [1], [0, 0, 1, 1], [], []>} : vector<8x64xbf16>, vector<64x32xbf16>, vector<8x32xf32> -> vector<8x32xf32>
    %157 = arith.addf %112, %156 : vector<8x32xf32>
    %c0_100 = arith.constant 0 : index
    %c0_101 = arith.constant 0 : index
    %158 = vector.load %arg13[%c0_100, %c0_101] : memref<1x32xf32, #tpu.memory_space<vmem>>, vector<1x32xf32>
    %159 = vector.broadcast %158 : vector<1x32xf32> to vector<8x32xf32>
    %160 = arith.addf %157, %159 : vector<8x32xf32>
    %161 = vector.shape_cast %160 : vector<8x32xf32> to vector<1x8x32xf32>
    %c0_102 = arith.constant 0 : index
    %c0_103 = arith.constant 0 : index
    %c0_104 = arith.constant 0 : index
    %162 = vector.load %arg14[%c0_102, %c0_103, %c0_104] : memref<1x8x32xf32, #tpu.memory_space<vmem>>, vector<1x8x32xf32>
    tpu.vector_store %arg14[%c0_102, %c0_103, %c0_104], %161 {strides = array<i32>} : memref<1x8x32xf32, #tpu.memory_space<vmem>>, vector<1x8x32xf32>,
    return
  }
  func.func @transform_0(%arg0: i32) -> (i32, i32, i32) {
    %c0_i32 = arith.constant 0 : i32
    %c0_i32_0 = arith.constant 0 : i32
    %c0_i32_1 = arith.constant 0 : i32
    return %arg0, %c0_i32, %c0_i32_0 : i32, i32, i32
  }
  func.func @transform_1(%arg0: i32) -> (i32, i32) {
    %c0_i32 = arith.constant 0 : i32
    %c0_i32_0 = arith.constant 0 : i32
    %c0_i32_1 = arith.constant 0 : i32
    return %c0_i32, %c0_i32_0 : i32, i32
  }
  func.func @transform_2(%arg0: i32) -> (i32, i32) {
    %c0_i32 = arith.constant 0 : i32
    %c0_i32_0 = arith.constant 0 : i32
    %c0_i32_1 = arith.constant 0 : i32
    return %c0_i32, %c0_i32_0 : i32, i32
  }
  func.func @transform_3(%arg0: i32) -> (i32, i32) {
    %c0_i32 = arith.constant 0 : i32
    %c0_i32_0 = arith.constant 0 : i32
    %c0_i32_1 = arith.constant 0 : i32
    return %c0_i32, %c0_i32_0 : i32, i32
  }
  func.func @transform_4(%arg0: i32) -> (i32, i32) {
    %c0_i32 = arith.constant 0 : i32
    %c0_i32_0 = arith.constant 0 : i32
    %c0_i32_1 = arith.constant 0 : i32
    return %c0_i32, %c0_i32_0 : i32, i32
  }
  func.func @transform_5(%arg0: i32) -> (i32, i32) {
    %c0_i32 = arith.constant 0 : i32
    %c0_i32_0 = arith.constant 0 : i32
    %c0_i32_1 = arith.constant 0 : i32
    return %c0_i32, %c0_i32_0 : i32, i32
  }
  func.func @transform_6(%arg0: i32) -> (i32, i32) {
    %c0_i32 = arith.constant 0 : i32
    %c0_i32_0 = arith.constant 0 : i32
    %c0_i32_1 = arith.constant 0 : i32
    return %c0_i32, %c0_i32_0 : i32, i32
  }
  func.func @transform_7(%arg0: i32) -> (i32, i32) {
    %c0_i32 = arith.constant 0 : i32
    %c0_i32_0 = arith.constant 0 : i32
    %c0_i32_1 = arith.constant 0 : i32
    return %c0_i32, %c0_i32_0 : i32, i32
  }
  func.func @transform_8(%arg0: i32) -> (i32, i32) {
    %c0_i32 = arith.constant 0 : i32
    %c0_i32_0 = arith.constant 0 : i32
    %c0_i32_1 = arith.constant 0 : i32
    return %c0_i32, %c0_i32_0 : i32, i32
  }
  func.func @transform_9(%arg0: i32) -> (i32, i32) {
    %c0_i32 = arith.constant 0 : i32
    %c0_i32_0 = arith.constant 0 : i32
    %c0_i32_1 = arith.constant 0 : i32
    return %c0_i32, %c0_i32_0 : i32, i32
  }
  func.func @transform_10(%arg0: i32) -> (i32, i32) {
    %c0_i32 = arith.constant 0 : i32
    %c0_i32_0 = arith.constant 0 : i32
    %c0_i32_1 = arith.constant 0 : i32
    return %c0_i32, %c0_i32_0 : i32, i32
  }
  func.func @transform_11(%arg0: i32) -> (i32, i32) {
    %c0_i32 = arith.constant 0 : i32
    %c0_i32_0 = arith.constant 0 : i32
    %c0_i32_1 = arith.constant 0 : i32
    return %c0_i32, %c0_i32_0 : i32, i32
  }
  func.func @transform_12(%arg0: i32) -> (i32, i32) {
    %c0_i32 = arith.constant 0 : i32
    %c0_i32_0 = arith.constant 0 : i32
    %c0_i32_1 = arith.constant 0 : i32
    return %c0_i32, %c0_i32_0 : i32, i32
  }
  func.func @transform_13(%arg0: i32) -> (i32, i32, i32) {
    %c0_i32 = arith.constant 0 : i32
    %c0_i32_0 = arith.constant 0 : i32
    %c0_i32_1 = arith.constant 0 : i32
    return %arg0, %c0_i32, %c0_i32_0 : i32, i32, i32
  }
}

</mosaic_0001>

<bundles_post_ra>
// kernel: tpu_custom_call.1
= control target key start
LH: loop header
LB: loop body
LE: loop exit
PB: predicated region body
PF: predicated region fallthrough
CT: control target
= control target key end

     0   :  { %s2395_s0 = inlined_call_operand.vmem [shape: f32[2,8,32], index: 0, kind: input, shape index: {}]   ;;  %s2396_s1 = inlined_call_operand.vmem [shape: bf16[32,96], index: 1, kind: input, shape index: {}]   ;;  %s2397_s2 = inlined_call_operand.vmem [shape: f32[1,96], index: 2, kind: input, shape index: {}]   ;;  %s2398_s3 = inlined_call_operand.vmem [shape: bf16[32,32], index: 3, kind: input, shape index: {}]   ;;  %s2399_s4 = inlined_call_operand.vmem [shape: f32[1,32], index: 4, kind: input, shape index: {}]   ;;  %s2400_s5 = inlined_call_operand.hbm [shape: f32[1,32], index: 5, kind: input, shape index: {}]   ;;  %s2401_s6 = inlined_call_operand.hbm [shape: f32[1,32], index: 6, kind: input, shape index: {}]   ;;  %s2402_s7 = inlined_call_operand.hbm [shape: f32[1,32], index: 7, kind: input, shape index: {}]   ;;  %s2403_s8 = inlined_call_operand.hbm [shape: f32[1,32], index: 8, kind: input, shape index: {}]   ;;  %s2404_s9 = inlined_call_operand.vmem [shape: bf16[32,64], index: 9, kind: input, shape index: {}]   ;;  %s2405_s10 = inlined_call_operand.vmem [shape: f32[1,64], index: 10, kind: input, shape index: {}]   ;;  %s2406_s11 = inlined_call_operand.vmem [shape: bf16[64,32], index: 11, kind: input, shape index: {}]   ;;  %s2407_s12 = inlined_call_operand.vmem [shape: f32[1,32], index: 12, kind: input, shape index: {}]   ;;  %s2408_s13 = inlined_call_operand.hbm [shape: f32[2,8,32], index: 13, kind: output, shape index: {}]  }
   0x1   :  { %2419 = sst [smem:[#allocation23_spill]] %s2408_s13 }
   0x2   :  { %18 = vsyncpa [#allocation5], 0 }
   0x3   :  { %19 = vsyncpa [#allocation8], 0 }
   0x4   :  { %20 = vsyncpa [#allocation11], 0 }
   0x5   :  { %21 = vsyncpa [#allocation6], 0 }
   0x6   :  { %23 = vsyncpa [#allocation6 + $0x1], 0  ;;  %s2033_s25 = smov 0   ;;  %s2035_s26 = smov 0  }
   0x7   :  { %s2037_s27 = smov 0   ;;  %s2039_s28 = smov 0  }
   0x8 LB: > { %2420 = sst [smem:[#allocation17_spill]] %s1928_s25  ;;  %s2054_s29 = sadd.s32 4294967295, %s1940_s28   ;;  %s1940_s28 = sphi %s2039_s28, %s2444_s28   ;;  %s1936_s27 = sphi %s2037_s27, %s2446_s27   ;;  %s1932_s26 = sphi %s2035_s26, %s2448_s26   ;;  %s1928_s25 = sphi %s2033_s25, %s2447_s25  }
   0x9   : > { %2421 = sst [smem:[#allocation18_spill]] %s1936_s27  ;;  %s1450_s30 = sadd.s32 4294967294, %s1940_s28  }
   0xa   : > { %2422 = sst [smem:[#allocation19_spill]] %s1940_s28  ;;  %s2058_s14 = sadd.s32 1, %s1940_s28  }
   0xb   : > { %2423 = sst [smem:[#allocation20_spill]] %s2058_s14  ;;  %s314_s15 = sadd.s32 1, %s1936_s27 }
   0xc   : > { %s311_s16 = ssub.s32 %s1940_s28, %s2058_s14  ;;  %p324_p0 = scmp.ne.s32.totalorder %s1936_s27, %s1932_s26 }
   0xd   : > { %p312_p1 = scmp.eq.s32.totalorder %s311_s16, 0  ;;  %p325_p2 = scmp.eq.s32.totalorder %s2054_s29, 1 }
   0xe   : > { %p330_p3 = scmp.ne.s32.totalorder %s1932_s26, %s1928_s25  ;;  %p331_p4 = scmp.eq.s32.totalorder %s1450_s30, 1 }
   0xf   : > { %s2069_s17 = scalar_select %p312_p1, %s1936_s27, %s314_s15  }
  0x10   : > { %p2071_p5 = por %p325_p2, %p324_p0  ;;  %p2075_p6 = por %p331_p4, %p330_p3 }
  0x11   : > { %2424 = sst [smem:[#allocation21_spill]] %s2069_s17  ;;  %p1451_p7 = scmp.ge.s32.totalorder %s1940_s28, 1 }
  0x12   : > { %s2425_s18 = scalar_select %p2071_p5, 1, 0 }
  0x13   : > { %s2426_s19 = scalar_select %p2075_p6, 1, 0 }
  0x14   : > { %p338_p8 = scmp.lt.s32.totalorder %s1940_s28, 3  ;;  %p2414_p9 = scmp.eq.s32.totalorder %s2054_s29, 0 }
  0x15   : > { %2427 = sst [smem:[#allocation22_spill]] %s2426_s19  ;;  %s1942_s21 = smov [#allocation7]  }
  0x16   : > { %p2082_p10 = pnand %p1451_p7, %p338_p8  ;;  %s374_s22 = sshll.u32 %s1942_s21, 4  ;;  %s375_s22 = int_to_ptr.vmem [resolvable:$true] %s374_s22 }
  0x17   : > { %s1943_s23 = smov [#allocation4]   ;;  %s1944_s15 = smov [#allocation9]  }
  0x18   : > { %s2428_s20 = scalar_select %p2082_p10, 1, 0 }
  0x19   : > { %p1640_p11 = pneg %p2082_p10  ;;  %s363_s24 = sshll.u32 %s1943_s23, 4  ;;  %s2094_s24 = int_to_ptr.vmem [resolvable:$true] %s363_s24 }
  0x1a   : > { %s385_s16 = sshll.u32 %s1944_s15, 4  ;;  %s1754_s21 = scalar_lea.hbm %s2401_s6, 16  ;;  %s2096_s16 = int_to_ptr.vmem [resolvable:$true] %s385_s16 }
  0x1b   : > { %p2090_p12 = pnand %p2414_p9, %p1640_p11  ;;  %p1755_p13 = scmp.ne.s32.totalorder %s2401_s6, %s1754_s21 }
  0x1c   : > { %p1761_p3 = scmp.lt.u32.totalorder %s1754_s21, %s2401_s6 }
  0x1d   : > { %p2106_p0 = pneg %p2090_p12 }
  0x1f   : > { %p1757_p1 = pnand %p2106_p0, %p1755_p13 }
  0x21   : > { %p1758_p2 = pneg %p1757_p1 }
  0x23   : > { %p1763_p4 = pnand %p1761_p3, %p1758_p2 }
  0x25   : > { %1766 = shalt.err (!%p1763_p4)
}
  0x26   : > { %s1767_s27 = scalar_lea.vmem %s375_s22, 16  ;;  %s1774_s14 = scalar_lea.vmem %s375_s22, 32 }
  0x27   : > { %p1768_p7 = scmp.ne.s32.totalorder %s375_s22, %s1767_s27  ;;  %p1775_p9 = scmp.lt.s32.totalorder %s375_s22, %s375_s22 }
  0x28   : > { %p1776_p6 = scmp.lt.s32.totalorder %s1774_s14, %s1767_s27 }
  0x29   : > { %p1770_p8 = pnand %p1768_p7, %p2106_p0 }
  0x2a   : > { %p1777_p5 = por %p1776_p6, %p1775_p9 }
  0x2b   : > { %p1771_p11 = pneg %p1770_p8 }
  0x2d   : > { %p1778_p10 = pnand %p1777_p5, %p1771_p11 }
  0x2f   : > { %1781 = shalt.err (!%p1778_p10)
}
  0x30   : > { %1646 = dma.hbm_to_vmem [thread:$0]  (!%p2090_p12), %s2401_s6, 16, %s375_s22, [#allocation8]  }
  0x31   : > { %s1782_s15 = scalar_lea.hbm %s2400_s5, 16 }
  0x32   : > { %p1783_p13 = scmp.ne.s32.totalorder %s2400_s5, %s1782_s15  ;;  %p1789_p5 = scmp.lt.u32.totalorder %s1782_s15, %s2400_s5 }
  0x34   : > { %p1785_p1 = pnand %p1783_p13, %p2106_p0 }
  0x36   : > { %p1786_p6 = pneg %p1785_p1 }
  0x38   : > { %p1791_p9 = pnand %p1789_p5, %p1786_p6 }
  0x3a   : > { %1794 = shalt.err (!%p1791_p9)
}
  0x3b   : > { %s1795_s22 = scalar_lea.vmem %s2094_s24, 16  ;;  %s1802_s13 = scalar_lea.vmem %s2094_s24, 32 }
  0x3c   : > { %p1796_p10 = scmp.ne.s32.totalorder %s2094_s24, %s1795_s22  ;;  %p1803_p4 = scmp.lt.s32.totalorder %s2094_s24, %s2094_s24 }
  0x3d   : > { %p1804_p7 = scmp.lt.s32.totalorder %s1802_s13, %s1795_s22 }
  0x3e   : > { %p1798_p2 = pnand %p1796_p10, %p2106_p0 }
  0x3f   : > { %p1805_p8 = por %p1804_p7, %p1803_p4 }
  0x40   : > { %p1799_p3 = pneg %p1798_p2 }
  0x42   : > { %p1806_p11 = pnand %p1805_p8, %p1799_p3 }
  0x44   : > { %1809 = shalt.err (!%p1806_p11)
}
  0x45   : > { %1643 = dma.hbm_to_vmem [thread:$0]  (!%p2090_p12), %s2400_s5, 16, %s2094_s24, [#allocation5]  }
  0x46   : > { %s1810_s21 = scalar_lea.hbm %s2402_s7, 16 }
  0x47   : > { %p1811_p13 = scmp.ne.s32.totalorder %s2402_s7, %s1810_s21  ;;  %p1817_p5 = scmp.lt.u32.totalorder %s1810_s21, %s2402_s7 }
  0x49   : > { %p1813_p1 = pnand %p1811_p13, %p2106_p0 }
  0x4b   : > { %p1814_p6 = pneg %p1813_p1 }
  0x4d   : > { %p1819_p9 = pnand %p1817_p5, %p1814_p6 }
  0x4f   : > { %1822 = shalt.err (!%p1819_p9)
}
  0x50   : > { %s1823_s24 = scalar_lea.vmem %s2096_s16, 16  ;;  %s1830_s13 = scalar_lea.vmem %s2096_s16, 32 }
  0x51   : > { %p1824_p10 = scmp.ne.s32.totalorder %s2096_s16, %s1823_s24  ;;  %p1831_p4 = scmp.lt.s32.totalorder %s2096_s16, %s2096_s16 }
  0x52   : > { %p1832_p7 = scmp.lt.s32.totalorder %s1830_s13, %s1823_s24 }
  0x53   : > { %p1826_p2 = pnand %p1824_p10, %p2106_p0 }
  0x54   : > { %p1833_p8 = por %p1832_p7, %p1831_p4 }
  0x55   : > { %p1827_p3 = pneg %p1826_p2 }
  0x57   : > { %p1834_p11 = pnand %p1833_p8, %p1827_p3 }
  0x59   : > { %1837 = shalt.err (!%p1834_p11)
}
  0x5a   : > { %1649 = dma.hbm_to_vmem [thread:$0]  (!%p2090_p12), %s2402_s7, 16, %s2096_s16, [#allocation8]  }
  0x5b   : > { %s1945_s19 = smov [#allocation10]   ;;  %s1838_s27 = scalar_lea.hbm %s2403_s8, 16 }
  0x5c   : > { %s396_s25 = sshll.u32 %s1945_s19, 4  ;;  %p1839_p13 = scmp.ne.s32.totalorder %s2403_s8, %s1838_s27  ;;  %s397_s25 = int_to_ptr.vmem [resolvable:$true] %s396_s25 }
  0x5d   : > { %p1845_p5 = scmp.lt.u32.totalorder %s1838_s27, %s2403_s8 }
  0x5e   : > { %p1841_p1 = pnand %p1839_p13, %p2106_p0 }
  0x60   : > { %p1842_p6 = pneg %p1841_p1 }
  0x62   : > { %p1847_p9 = pnand %p1845_p5, %p1842_p6 }
  0x64   : > { %1850 = shalt.err (!%p1847_p9)
}
  0x65   : > { %s1851_s16 = scalar_lea.vmem %s397_s25, 16  ;;  %s1858_s28 = scalar_lea.vmem %s397_s25, 32 }
  0x66   : > { %p1852_p10 = scmp.ne.s32.totalorder %s397_s25, %s1851_s16  ;;  %p1859_p4 = scmp.lt.s32.totalorder %s397_s25, %s397_s25 }
  0x67   : > { %p1860_p7 = scmp.lt.s32.totalorder %s1858_s28, %s1851_s16 }
  0x68   : > { %p1854_p2 = pnand %p1852_p10, %p2106_p0 }
  0x69   : > { %p1861_p8 = por %p1860_p7, %p1859_p4 }
  0x6a   : > { %p1855_p3 = pneg %p1854_p2 }
  0x6c   : > { %p1862_p11 = pnand %p1861_p8, %p1855_p3 }
  0x6e   : > { %1865 = shalt.err (!%p1862_p11)
}
  0x6f   : > { %1652 = dma.hbm_to_vmem [thread:$0]  (!%p2090_p12), %s2403_s8, 16, %s397_s25, [#allocation11]  }
  0x70   : > { %p2431_p13 = scmp.ne.s32.totalorder %s2428_s20, 0 }
  0x71   : > { %p2432_p1 = scmp.eq.s32.totalorder (!%p2431_p13), %s2054_s29, 0 }
  0x72   : > { %428 = sbr.rel (%p2431_p13) target bundleno = 2577 (0xa11), region = 72 }
  0x79   : > { %1911 = dma.done.wait (%p2432_p1), [#allocation5], 16   ;;  %p2433_p0 = pmov %p2432_p1 }
  0x7b   : > { %1913 = vsyncadd (%p2433_p0), [#allocation5], 4294967280  ;;  %p2434_p6 = pmov %p2433_p0 }
  0x7c   : > { %p2435_p5 = pmov %p2433_p0 }
  0x7d   : > { %1915 = dma.done.wait (%p2434_p6), [#allocation8], 32  }
  0x7e   : > { %1917 = vsyncadd (%p2435_p5), [#allocation8], 4294967264  ;;  %p2436_p9 = pmov %p2433_p0 }
  0x7f   : > { %p2437_p12 = pmov %p2433_p0 }
  0x80   : > { %1919 = dma.done.wait (%p2436_p9), [#allocation11], 16  }
  0x81   : > { %1921 = vsyncadd (%p2437_p12), [#allocation11], 4294967280  ;;  %p483_p10 = scmp.lt.s32.totalorder %s2054_s29, 1  ;;  %vm491_vm0 = vcmask 261120   ;;  %v1718_v7 = vld [vmem:[%s2396_s1] sm:$0xff]   ;;  %v1946_v8 = vmov 0.0  }
  0x82   : > { %1538 = vmatprep.subr.bf16.mxu0 %v1946_v8  ;;  %vm1947_vm1 = vmmov 0   ;;  %v1719_v9 = vld [vmem:[%s2396_s1 + $0x8] sm:$0xff]   ;;  %1546 = vmatprep.subr.bf16.mxu1 %v1946_v8  ;;  %v1466_v20 = vld [vmem:[%s2397_s2] ss:$0 sm:$0xff]  ;;  %vm588_vm2 = vcmask 781312   ;;  %s1948_s16 = smov 120  }
  0x83   : > { %s484_s20 = scalar_select %p483_p10, %s2054_s29, 1  ;;  %1542 = vmatprep.mubr.msk.bf16.mxu0 %vm1947_vm1, %v1946_v8  ;;  %1539 = vmatpush3.bf16.msra.mxu0 %v1718_v7  ;;  %v1464_v14 = vld [vmem:[#allocation4] ss:$0 sm:$0xff]  ;;  %v1465_v16 = vld [vmem:[#allocation7] ss:$0 sm:$0xff]  ;;  %vm596_vm3 = vcmask 64512  }
  0x84   : > { %1540 = vmatprep.subr.bf16.mxu0 %v1946_v8  ;;  %1548 = vmatprep.mubr.msk.bf16.mxu1 %vm1947_vm1, %v1946_v8  ;;  %s1949_s28 = smov 96   ;;  %s1950_s17 = smov 88   ;;  %vm658_vm4 = vcmask 1043456   ;;  %vm705_vm5 = vcmask 60416   ;;  %vm828_vm6 = vcmask 126016   ;;  %vm951_vm7 = vcmask 191616  }
  0x85   : > { %s1463_s30 = sshll.u32 %s484_s20, 3  ;;  %s1951_s19 = smov 80   ;;  %vm1074_vm8 = vcmask 257216   ;;  %vm1282_vm9 = vcmask 523264  }
  0x86   : > { %s486_s21 = scalar_lea.vmem %s2395_s0, %s1463_s30  ;;  %s1952_s20 = smov 112  }
  0x87   : > { %v2207_v0 = vld [vmem:[%s486_s21] sm:$0xff]  ;;  %1541 = vmatpush3.bf16.msra.mxu0 %v1719_v9  ;;  %s1953_s30 = smov 72   ;;  %s1954_s23 = smov 104  }
  0x88   : > { %v492_v1 = vsel %vm491_vm0, %v2207_v0, 0.0  ;;  %1552 = vmatprep.subr.bf16.mxu0 %v1946_v8  ;;  %s1955_s25 = smov 64   ;;  %s1956_s21 = smov 56  }
  0x89   : > { %493 = vadd.xlane.f32.xlu0 %v492_v1  ;;  %s1957_s15 = smov 48   ;;  %s1958_s27 = smov 40  }
  0x8a   : > { %s1959_s14 = smov 8   ;;  %s2438_s24 = sld [smem:[#allocation23_spill]] }
  0x8b   : > { %p2439_p3 = scmp.ne.s32.totalorder %s2425_s18, 0 }
 0x116   : > { %v494_v2 = vpop.xlane.xlu0 %493 }
 0x117   : > { %v496_v3 = vmul.f32 0.03125, %v494_v2 }
 0x119   : > { %v497_v4 = vsub.f32 %v2207_v0, %v496_v3 }
 0x11b   : > { %v498_v5 = vmul.f32 %v497_v4, %v497_v4 }
 0x11d   : > { %v499_v6 = vsel %vm491_vm0, %v498_v5, 0.0 }
 0x11e   : > { %500 = vadd.xlane.f32.xlu0 %v499_v6 }
 0x1ab   : > { %v501_v10 = vpop.xlane.xlu0 %500 }
 0x1ac   : > { %v502_v11 = vmul.f32 0.03125, %v501_v10 }
 0x1ae   : > { %v503_v12 = vadd.f32 1e-05, %v502_v11 }
 0x1b0   : > { %1732 = vrsqrt.f32 %v503_v12 }
 0x1ba   : > { %v1733_v13 = vpop.eup %1732 }
 0x1bb   : > { %v505_v15 = vmul.f32 %v1733_v13, %v497_v4 }
 0x1bd   : > { %v512_v17 = vmul.f32 %v1464_v14, %v505_v15 }
 0x1bf   : > { %v519_v18 = vadd.f32 %v1465_v16, %v512_v17 }
 0x1c1   : > { %v520_v19 = vpack.c.bf16 %v519_v18, %v519_v18 }
 0x1c3   : > { %1543 = vmatmul.mubr.msk.bf16.vlgmr.msra.gmra.mrb[0].mxu0 %vm491_vm0, %v520_v19 }
 0x1c4   : > { %1554 = vmatprep.mubr.msk.bf16.mxu0 %vm1947_vm1, %v1946_v8 }
 0x296   : > { %v581_v21 = vpop.f32.mrb[0].mxu0 }
 0x297   : > { %v582_v22 = vadd.f32 %v1466_v20, %v581_v21  ;;  %v1544_v23 = vpop.f32.mrb[1].mxu0 }
 0x298   : > { %v584_v24 = vpop.f32.mrb[2].mxu0 }
 0x299   : > { %v587_v25 = vpack.c.bf16 %v582_v22, %v582_v22  ;;  %v1545_v26 = vpop.f32.mrb[3].mxu0 }
 0x29b   : > { %589 = vst.msk [vmem:[#allocation2] sm:$0xf] %vm588_vm2, %v587_v25 }
 0x2a2   : > { %v2233_v27 = vld [vmem:[#allocation2] ss:$0 sps:$4 sm:$0xff]  }
 0x2a3   : > { %v590_v28 = vld [vmem:[#allocation2] sm:$0xf]  ;;  %711 = vrot.lane.b32.xlu0 %v2233_v27, %s1948_s16 }
 0x2a4   : > { %v1470_v29 = vcombine.low %v590_v28, %v590_v28  ;;  %v2237_v30 = vld [vmem:[#allocation2] ss:$0 sps:$4 sm:$0xff]  }
 0x2a5   : > { %v2241_v31 = vld [vmem:[#allocation2] ss:$0 sps:$4 sm:$0xff]  }
 0x2a6   : > { %594 = vrot.lane.b32.xlu1 %v1470_v29, %s1949_s28  ;;  %s1960_s28 = smov 16  }
 0x2aa   : > { %713 = vrot.lane.b32.xlu1 %v2233_v27, %s1950_s17  ;;  %s1961_s17 = smov 24  }
 0x2ae   : > { %836 = vrot.lane.b32.xlu1 %v2237_v30, %s1951_s19 }
 0x2b2   : > { %834 = vrot.lane.b32.xlu1 %v2237_v30, %s1952_s20  ;;  %s480_s20 = sand.u32 1, %s1932_s26  }
 0x2b6   : > { %959 = vrot.lane.b32.xlu1 %v2241_v31, %s1953_s30  ;;  %s1462_s30 = sshll.u32 %s480_s20, 3 }
 0x2ba   : > { %957 = vrot.lane.b32.xlu1 %v2241_v31, %s1954_s23 }
 0x315   : > { %v712_v37 = vpop.permute.xlu0 %711 }
 0x318   : > { %v595_v32 = vpop.permute.xlu1 %594 }
 0x319   : > { %v601_v33 = vsel %vm596_vm3, %v595_v32, 0 }
 0x31a   : > { %1547 = vmatpush3.bf16.xpose.msra.mxu1 %v601_v33 }
 0x31b   : > { %1558 = vmatprep.subr.bf16.mxu1 %v1946_v8 }
 0x31c   : > { %v714_v34 = vpop.permute.xlu1 %713 }
 0x31d   : > { %v719_v35 = vsel %vm596_vm3, %v714_v34, 0 }
 0x320   : > { %v837_v36 = vpop.permute.xlu1 %836 }
 0x321   : > { %1549 = vmatmul.mubr.msk.bf16.vlgmr.msra.gmra.mrb[0].mxu1 %vm596_vm3, %v590_v28  ;;  %v842_v39 = vsel %vm596_vm3, %v837_v36, 0 }
 0x322   : > { %1559 = vmatpush3.bf16.xpose.msra.mxu1 %v719_v35  ;;  %1560 = vmatprep.mubr.msk.bf16.mxu1 %vm1947_vm1, %v1946_v8 }
 0x323   : > { %1570 = vmatprep.subr.bf16.mxu1 %v1946_v8 }
 0x324   : > { %v835_v38 = vpop.permute.xlu1 %834 }
 0x328   : > { %v960_v40 = vpop.permute.xlu1 %959 }
 0x329   : > { %1561 = vmatmul.mubr.msk.bf16.vlgmr.msra.gmra.mrb[4].mxu1 %vm596_vm3, %v712_v37  ;;  %v965_v41 = vsel %vm596_vm3, %v960_v40, 0 }
 0x32a   : > { %1571 = vmatpush3.bf16.xpose.msra.mxu1 %v842_v39  ;;  %1572 = vmatprep.mubr.msk.bf16.mxu1 %vm1947_vm1, %v1946_v8 }
 0x32b   : > { %1582 = vmatprep.subr.bf16.mxu1 %v1946_v8 }
 0x32c   : > { %v958_v42 = vpop.permute.xlu1 %957 }
 0x331   : > { %1573 = vmatmul.mubr.msk.bf16.vlgmr.msra.gmra.mrb[8].mxu1 %vm596_vm3, %v835_v38 }
 0x332   : > { %1583 = vmatpush3.bf16.xpose.msra.mxu1 %v965_v41  ;;  %1584 = vmatprep.mubr.msk.bf16.mxu1 %vm1947_vm1, %v1946_v8 }
 0x333   : > { %1594 = vmatprep.subr.bf16.mxu1 %v1946_v8 }
 0x339   : > { %1585 = vmatmul.mubr.msk.bf16.vlgmr.msra.gmra.mrb[12].mxu1 %vm596_vm3, %v958_v42 }
 0x33a   : > { %1598 = vmatprep.mubr.msk.bf16.mxu1 %vm1947_vm1, %v1946_v8 }
 0x3f4   : > { %v637_v43 = vpop.f32.mrb[0].mxu1 }
 0x3f5   : > { %v1550_v44 = vpop.f32.mrb[1].mxu1  ;;  %v643_v45 = vsel %vm596_vm3, %v637_v43, -inf }
 0x3f6   : > { %644 = vmax.xlane.f32.xlu1 %v643_v45  ;;  %v640_v46 = vpop.f32.mrb[2].mxu1 }
 0x3f7   : > { %v1551_v47 = vpop.f32.mrb[3].mxu1 }
 0x3fc   : > { %v755_v48 = vpop.f32.mrb[4].mxu1 }
 0x3fd   : > { %v1562_v49 = vpop.f32.mrb[5].mxu1  ;;  %v761_v50 = vsel %vm596_vm3, %v755_v48, -inf }
 0x3fe   : > { %762 = vmax.xlane.f32.xlu0 %v761_v50  ;;  %v758_v51 = vpop.f32.mrb[6].mxu1 }
 0x3ff   : > { %v1563_v52 = vpop.f32.mrb[7].mxu1 }
 0x404   : > { %v878_v53 = vpop.f32.mrb[8].mxu1 }
 0x405   : > { %v1574_v54 = vpop.f32.mrb[9].mxu1  ;;  %v884_v62 = vsel %vm596_vm3, %v878_v53, -inf }
 0x406   : > { %v881_v55 = vpop.f32.mrb[10].mxu1 }
 0x407   : > { %653 = vrot.lane.b32.xlu1 %v1470_v29, %s1955_s25  ;;  %v1575_v56 = vpop.f32.mrb[11].mxu1 }
 0x40c   : > { %v1001_v57 = vpop.f32.mrb[12].mxu1 }
 0x40d   : > { %v1586_v58 = vpop.f32.mrb[13].mxu1  ;;  %v1007_v59 = vsel %vm596_vm3, %v1001_v57, -inf }
 0x40e   : > { %1008 = vmax.xlane.f32.xlu0 %v1007_v59  ;;  %v1004_v60 = vpop.f32.mrb[14].mxu1 }
 0x40f   : > { %v1587_v61 = vpop.f32.mrb[15].mxu1 }
 0x424   : > { %771 = vrot.lane.b32.xlu0 %v2233_v27, %s1956_s21  ;;  %s1502_s21 = sshll.u32 %s2054_s29, 7  ;;  %s1337_s29 = scalar_lea.sflag [#allocation6], %s480_s20 }
 0x425   : > { %s2352_s13 = scalar_lea.hbm %s2438_s24, %s1502_s21 }
 0x42b   : > { %885 = vmax.xlane.f32.xlu1 %v884_v62 }
 0x43c   : > { %894 = vrot.lane.b32.xlu1 %v2237_v30, %s1957_s15  ;;  %s482_s15 = scalar_lea.vmem [#allocation12], %s1462_s30 }
 0x440   : > { %1017 = vrot.lane.b32.xlu1 %v2241_v31, %s1958_s27  ;;  %s1350_s27 = sshll.u32 %s482_s15, 4  ;;  %s2354_s27 = int_to_ptr.vmem [resolvable:$true] %s1350_s27 }
 0x441   : > { %s1866_s16 = scalar_lea.vmem %s2354_s27, 128 }
 0x442   : > { %p1867_p2 = scmp.ne.s32.totalorder %s2354_s27, %s1866_s16 }
 0x444   : > { %p1868_p4 = pnand %p1867_p2, %p2439_p3 }
 0x446   : > { %p1869_p7 = pneg %p1868_p4 }
 0x483   : > { %v645_v63 = vpop.xlane.xlu1 %644 }
 0x484   : > { %v646_v1 = vsub.f32 %v637_v43, %v645_v63 }
 0x486   : > { %v647_v2 = vmul.f32 1.442695, %v646_v1 }
 0x487   : > { %v654_v3 = vpop.permute.xlu1 %653 }
 0x488   : > { %1734 = vpow2.f32 %v647_v2  ;;  %v660_v4 = vsel %vm658_vm4, %v654_v3, 0 }
 0x489   : > { %1553 = vmatpush3.bf16.msra.mxu0 %v660_v4 }
 0x48a   : > { %1564 = vmatprep.subr.bf16.mxu0 %v1946_v8 }
 0x48b   : > { %v763_v5 = vpop.xlane.xlu0 %762 }
 0x48c   : > { %v764_v6 = vsub.f32 %v755_v48, %v763_v5 }
 0x48e   : > { %v765_v7 = vmul.f32 1.442695, %v764_v6 }
 0x490   : > { %1736 = vpow2.f32 %v765_v7 }
 0x492   : > { %v1735_v9 = vpop.eup %1734 }
 0x493   : > { %v652_v10 = vpack.c.bf16 %v1735_v9, %v1735_v9  ;;  %v649_v21 = vsel %vm596_vm3, %v1735_v9, 0.0  ;;  %v1485_v9 = vld [vmem:[%s2399_s4] ss:$0 sm:$0xff] }
 0x495   : > { %1555 = vmatmul.mubr.msk.bf16.vlgmr.msra.gmra.mrb[4].mxu0 %vm596_vm3, %v652_v10 }
 0x496   : > { %1566 = vmatprep.mubr.msk.bf16.mxu0 %vm1947_vm1, %v1946_v8 }
 0x49a   : > { %v1737_v11 = vpop.eup %1736 }
 0x49b   : > { %v1009_v12 = vpop.xlane.xlu0 %1008  ;;  %v767_v13 = vsel %vm596_vm3, %v1737_v11, 0.0  ;;  %v770_v18 = vpack.c.bf16 %v1737_v11, %v1737_v11 }
 0x49c   : > { %v1010_v14 = vsub.f32 %v1001_v57, %v1009_v12  ;;  %768 = vadd.xlane.f32.xlu0 %v767_v13  ;;  %v1725_v57 = vld [vmem:[%s2398_s3 + $0x8] sm:$0xff]  }
 0x49e   : > { %v1011_v15 = vmul.f32 1.442695, %v1010_v14 }
 0x49f   : > { %v772_v16 = vpop.permute.xlu0 %771 }
 0x4a0   : > { %1738 = vpow2.f32 %v1011_v15  ;;  %v777_v17 = vsel %vm658_vm4, %v772_v16, 0 }
 0x4a1   : > { %1565 = vmatpush3.bf16.msra.mxu0 %v777_v17 }
 0x4a2   : > { %1576 = vmatprep.subr.bf16.mxu0 %v1946_v8 }
 0x4a4   : > { %1567 = vmatmul.mubr.msk.bf16.vlgmr.msra.gmra.mrb[8].mxu0 %vm596_vm3, %v770_v18 }
 0x4a5   : > { %1578 = vmatprep.mubr.msk.bf16.mxu0 %vm1947_vm1, %v1946_v8 }
 0x4aa   : > { %v1739_v19 = vpop.eup %1738 }
 0x4ab   : > { %v1013_v20 = vsel %vm596_vm3, %v1739_v19, 0.0  ;;  %v1016_v32 = vpack.c.bf16 %v1739_v19, %v1739_v19 }
 0x4ac   : > { %1014 = vadd.xlane.f32.xlu0 %v1013_v20 }
 0x4b0   : > { %650 = vadd.xlane.f32.xlu0 %v649_v21 }
 0x4b8   : > { %v886_v22 = vpop.xlane.xlu1 %885 }
 0x4b9   : > { %v887_v23 = vsub.f32 %v878_v53, %v886_v22  ;;  %v1724_v53 = vld [vmem:[%s2398_s3] sm:$0xff]  }
 0x4ba   : > { %1595 = vmatpush3.bf16.msra.mxu1 %v1724_v53  ;;  %v1726_v22 = vld [vmem:[%s2404_s9] sm:$0xff]  }
 0x4bb   : > { %v888_v24 = vmul.f32 1.442695, %v887_v23  ;;  %1596 = vmatprep.subr.bf16.mxu1 %v1946_v8  ;;  %v1500_v53 = vld [vmem:[%s2407_s12] ss:$0 sm:$0xff] }
 0x4bc   : > { %v895_v25 = vpop.permute.xlu1 %894 }
 0x4bd   : > { %1740 = vpow2.f32 %v888_v24  ;;  %v900_v26 = vsel %vm658_vm4, %v895_v25, 0 }
 0x4be   : > { %1577 = vmatpush3.bf16.msra.mxu0 %v900_v26  ;;  %1597 = vmatpush3.bf16.msra.mxu1 %v1725_v57 }
 0x4bf   : > { %1588 = vmatprep.subr.bf16.mxu0 %v1946_v8  ;;  %1610 = vmatprep.subr.bf16.mxu1 %v1946_v8 }
 0x4c0   : > { %v1018_v28 = vpop.permute.xlu1 %1017 }
 0x4c1   : > { %v1023_v31 = vsel %vm658_vm4, %v1018_v28, 0 }
 0x4c7   : > { %v1741_v27 = vpop.eup %1740 }
 0x4c8   : > { %v890_v29 = vsel %vm596_vm3, %v1741_v27, 0.0  ;;  %v893_v30 = vpack.c.bf16 %v1741_v27, %v1741_v27  ;;  %v1489_v27 = vld [vmem:[#allocation9] ss:$0 sm:$0xff] }
 0x4c9   : > { %891 = vadd.xlane.f32.xlu1 %v890_v29  ;;  %v1490_v29 = vld [vmem:[#allocation10] ss:$0 sm:$0xff] }
 0x4ca   : > { %1579 = vmatmul.mubr.msk.bf16.vlgmr.msra.gmra.mrb[12].mxu0 %vm596_vm3, %v893_v30 }
 0x4cb   : > { %1589 = vmatpush3.bf16.msra.mxu0 %v1023_v31  ;;  %1590 = vmatprep.mubr.msk.bf16.mxu0 %vm1947_vm1, %v1946_v8 }
 0x4cc   : > { %1602 = vmatprep.subr.bf16.mxu0 %v1946_v8 }
 0x4d2   : > { %1591 = vmatmul.mubr.msk.bf16.vlgmr.msra.gmra.mrb[16].mxu0 %vm596_vm3, %v1016_v32 }
 0x4d3   : > { %1606 = vmatprep.mubr.msk.bf16.mxu0 %vm1947_vm1, %v1946_v8  ;;  %1603 = vmatpush3.bf16.msra.mxu0 %v1726_v22 }
 0x4d4   : > { %1604 = vmatprep.subr.bf16.mxu0 %v1946_v8 }
 0x529   : > { %v769_v33 = vpop.xlane.xlu0 %768 }
 0x539   : > { %v1015_v34 = vpop.xlane.xlu0 %1014 }
 0x53d   : > { %v651_v35 = vpop.xlane.xlu0 %650 }
 0x53e   : > { %1742 = vrcp.f32 %v651_v35  ;;  %v1730_v35 = vld [vmem:[%s2406_s11 + $0x10] sm:$0xff]  }
 0x53f   : > { %1744 = vrcp.f32 %v769_v33  ;;  %v1728_v33 = vld [vmem:[%s2406_s11] sm:$0xff]  }
 0x548   : > { %v1743_v36 = vpop.eup %1742 }
 0x549   : > { %v1745_v43 = vpop.eup %1744 }
 0x556   : > { %v892_v50 = vpop.xlane.xlu1 %891 }
 0x557   : > { %1746 = vrcp.f32 %v892_v50 }
 0x558   : > { %1748 = vrcp.f32 %v1015_v34  ;;  %v1729_v34 = vld [vmem:[%s2406_s11 + $0x8] sm:$0xff]  }
 0x561   : > { %v1747_v51 = vpop.eup %1746 }
 0x562   : > { %v1749_v60 = vpop.eup %1748 }
 0x568   : > { %v696_v37 = vpop.f32.mrb[4].mxu0 }
 0x569   : > { %v703_v38 = vmul.f32 %v1743_v36, %v696_v37  ;;  %v1556_v39 = vpop.f32.mrb[5].mxu0  ;;  %v1731_v36 = vld [vmem:[%s2406_s11 + $0x18] sm:$0xff]   ;;  %v1491_v37 = vld [vmem:[%s2405_s10] ss:$0 sm:$0xff] }
 0x56a   : > { %v699_v40 = vpop.f32.mrb[6].mxu0 }
 0x56b   : > { %v704_v41 = vpack.c.bf16 %v703_v38, %v703_v38  ;;  %v1557_v42 = vpop.f32.mrb[7].mxu0 }
 0x56d   : > { %706 = vst.msk [vmem:[#allocation3] sm:$0xf] %vm705_vm5, %v704_v41 }
 0x577   : > { %v813_v44 = vpop.f32.mrb[8].mxu0 }
 0x578   : > { %v820_v45 = vmul.f32 %v1745_v43, %v813_v44  ;;  %v1568_v46 = vpop.f32.mrb[9].mxu0 }
 0x579   : > { %v816_v47 = vpop.f32.mrb[10].mxu0 }
 0x57a   : > { %v1505_v48 = vpack.c.bf16 %v820_v45, %v820_v45  ;;  %v1569_v49 = vpop.f32.mrb[11].mxu0 }
 0x57c   : > { %825 = vrot.lane.b32.xlu1 %v1505_v48, %s1959_s14 }
 0x59d   : > { %v936_v52 = vpop.f32.mrb[12].mxu0 }
 0x59e   : > { %v943_v54 = vmul.f32 %v1747_v51, %v936_v52  ;;  %v1580_v55 = vpop.f32.mrb[13].mxu0 }
 0x59f   : > { %v939_v56 = vpop.f32.mrb[14].mxu0 }
 0x5a0   : > { %v1506_v58 = vpack.c.bf16 %v943_v54, %v943_v54  ;;  %v1581_v59 = vpop.f32.mrb[15].mxu0 }
 0x5a2   : > { %948 = vrot.lane.b32.xlu0 %v1506_v58, %s1960_s28  ;;  %s1962_s28 = smov [#allocation12]  }
 0x5a5   : > { %v1059_v61 = vpop.f32.mrb[16].mxu0 }
 0x5a6   : > { %v1066_v62 = vmul.f32 %v1749_v60, %v1059_v61  ;;  %v1592_v63 = vpop.f32.mrb[17].mxu0 }
 0x5a7   : > { %v1062_v1 = vpop.f32.mrb[18].mxu0 }
 0x5a8   : > { %v1507_v2 = vpack.c.bf16 %v1066_v62, %v1066_v62  ;;  %v1593_v3 = vpop.f32.mrb[19].mxu0 }
 0x5aa   : > { %1071 = vrot.lane.b32.xlu1 %v1507_v2, %s1961_s17  ;;  %s1870_s17 = sshll.u32 %s1962_s28, 4  ;;  %s1871_s17 = int_to_ptr.vmem [resolvable:$false] %s1870_s17 }
 0x5ab   : > { %s1872_s19 = scalar_lea.vmem %s1871_s17, 256  ;;  %p1873_p8 = scmp.lt.s32.totalorder %s2354_s27, %s1871_s17 }
 0x5ac   : > { %p1874_p11 = scmp.lt.s32.totalorder %s1872_s19, %s1866_s16 }
 0x5ae   : > { %p1875_p13 = por %p1874_p11, %p1873_p8 }
 0x5b0   : > { %p1876_p1 = pnand %p1875_p13, %p1869_p7 }
 0x5ee   : > { %v826_v4 = vpop.permute.xlu1 %825 }
 0x5ef   : > { %829 = vst.msk [vmem:[#allocation3] sm:$0xf] %vm828_vm6, %v826_v4 }
 0x614   : > { %v949_v5 = vpop.permute.xlu0 %948 }
 0x615   : > { %952 = vst.msk [vmem:[#allocation3] sm:$0xf] %vm951_vm7, %v949_v5 }
 0x61c   : > { %v1072_v6 = vpop.permute.xlu1 %1071 }
 0x61d   : > { %1075 = vst.msk [vmem:[#allocation3] sm:$0xf] %vm1074_vm8, %v1072_v6 }
 0x624   : > { %v1076_v7 = vld [vmem:[#allocation3] sm:$0xf] }
 0x625   : > { %1599 = vmatmul.mubr.msk.bf16.vlgmr.msra.gmra.mrb[16].mxu1 %vm491_vm0, %v1076_v7 }
 0x626   : > { %1618 = vmatprep.mubr.msk.bf16.mxu1 %vm1947_vm1, %v1946_v8  ;;  %1611 = vmatpush3.bf16.msra.mxu1 %v1728_v33 }
 0x627   : > { %1612 = vmatprep.subr.bf16.mxu1 %v1946_v8 }
 0x62a   : > { %1613 = vmatpush3.bf16.msra.mxu1 %v1729_v34 }
 0x62b   : > { %1614 = vmatprep.subr.bf16.mxu1 %v1946_v8 }
 0x62e   : > { %1615 = vmatpush3.bf16.msra.mxu1 %v1730_v35 }
 0x62f   : > { %1616 = vmatprep.subr.bf16.mxu1 %v1946_v8 }
 0x632   : > { %1617 = vmatpush3.bf16.msra.mxu1 %v1731_v36 }
 0x6f8   : > { %v1137_v10 = vpop.f32.mrb[16].mxu1 }
 0x6f9   : > { %v1138_v11 = vadd.f32 %v1485_v9, %v1137_v10  ;;  %v1600_v12 = vpop.f32.mrb[17].mxu1 }
 0x6fa   : > { %v1140_v13 = vpop.f32.mrb[18].mxu1 }
 0x6fb   : > { %v2311_v14 = vadd.f32 %v1138_v11, %v2207_v0  ;;  %v1601_v15 = vpop.f32.mrb[19].mxu1  ;;  %v1727_v0 = vld [vmem:[%s2404_s9 + $0x8] sm:$0xff]  }
 0x6fc   : > { %1605 = vmatpush3.bf16.msra.mxu0 %v1727_v0 }
 0x6fd   : > { %v1146_v16 = vsel %vm491_vm0, %v2311_v14, 0.0 }
 0x6fe   : > { %1147 = vadd.xlane.f32.xlu1 %v1146_v16 }
 0x78b   : > { %v1148_v17 = vpop.xlane.xlu1 %1147 }
 0x78c   : > { %v1149_v18 = vmul.f32 0.03125, %v1148_v17 }
 0x78e   : > { %v1150_v19 = vsub.f32 %v2311_v14, %v1149_v18 }
 0x790   : > { %v1151_v20 = vmul.f32 %v1150_v19, %v1150_v19 }
 0x792   : > { %v1152_v21 = vsel %vm491_vm0, %v1151_v20, 0.0 }
 0x793   : > { %1153 = vadd.xlane.f32.xlu0 %v1152_v21 }
 0x820   : > { %v1154_v23 = vpop.xlane.xlu0 %1153 }
 0x821   : > { %v1155_v24 = vmul.f32 0.03125, %v1154_v23 }
 0x823   : > { %v1156_v25 = vadd.f32 1e-05, %v1155_v24 }
 0x825   : > { %1750 = vrsqrt.f32 %v1156_v25 }
 0x82f   : > { %v1751_v26 = vpop.eup %1750 }
 0x830   : > { %v1158_v28 = vmul.f32 %v1751_v26, %v1150_v19 }
 0x832   : > { %v1165_v30 = vmul.f32 %v1489_v27, %v1158_v28 }
 0x834   : > { %v1172_v31 = vadd.f32 %v1490_v29, %v1165_v30 }
 0x836   : > { %v1173_v32 = vpack.c.bf16 %v1172_v31, %v1172_v31 }
 0x838   : > { %1607 = vmatmul.mubr.msk.bf16.vlgmr.msra.gmra.mrb[20].mxu0 %vm491_vm0, %v1173_v32 }
 0x90b   : > { %v1234_v38 = vpop.f32.mrb[20].mxu0 }
 0x90c   : > { %v1235_v39 = vadd.f32 %v1491_v37, %v1234_v38  ;;  %v1608_v40 = vpop.f32.mrb[21].mxu0 }
 0x90d   : > { %v1237_v41 = vpop.f32.mrb[22].mxu0 }
 0x90e   : > { %v1240_v42 = vmul.f32 %v1235_v39, %v1235_v39  ;;  %v1609_v43 = vpop.f32.mrb[23].mxu0 }
 0x910   : > { %v1241_v44 = vmul.f32 %v1240_v42, %v1235_v39 }
 0x912   : > { %v1242_v45 = vmul.f32 0.044715, %v1241_v44 }
 0x914   : > { %v1243_v8 = vadd.f32 %v1242_v45, %v1235_v39 }
 0x916   : > { %v1244_v46 = vmul.f32 0.7978846, %v1243_v8 }
 0x918   : > { %1752 = vtanh.f32 %v1244_v46 }
 0x922   : > { %v1753_v47 = vpop.eup %1752 }
 0x923   : > { %v1246_v48 = vadd.f32 1.0, %v1753_v47 }
 0x925   : > { %v1247_v49 = vmul.f32 0.5, %v1246_v48 }
 0x927   : > { %v1248_v50 = vmul.f32 %v1247_v49, %v1235_v39 }
 0x929   : > { %v1249_v51 = vpack.c.bf16 %v1248_v50, %v1248_v50 }
 0x92b   : > { %1619 = vmatmul.mubr.msk.bf16.vlgmr.msra.gmra.mrb[20].mxu1 %vm1282_vm9, %v1249_v51 }
 0x9fe   : > { %v1320_v52 = vpop.f32.mrb[20].mxu1 }
 0x9ff   : > { %v1326_v54 = vadd.f32 %v1320_v52, %v2311_v14  ;;  %v1620_v55 = vpop.f32.mrb[21].mxu1 }
 0xa00   : > { %v1323_v56 = vpop.f32.mrb[22].mxu1 }
 0xa01   : > { %v1334_v57 = vadd.f32 %v1500_v53, %v1326_v54  ;;  %v1621_v58 = vpop.f32.mrb[23].mxu1 }
 0xa03   : > { %1335 = vst.msk [vmem:[%s482_s15] sm:$0xff] %vm491_vm0, %v1334_v57 }
 0xa04   : > { %1879 = shalt.err (!%p1876_p1)
}
 0xa05   : > { %s1880_s20 = scalar_lea.hbm %s2352_s13, 128  ;;  %s1884_s25 = scalar_lea.hbm %s2438_s24, 256 }
 0xa06   : > { %p1881_p0 = scmp.ne.s32.totalorder %s2352_s13, %s1880_s20  ;;  %p1885_p9 = scmp.lt.u32.totalorder %s2352_s13, %s2438_s24 }
 0xa07   : > { %p1886_p12 = scmp.lt.u32.totalorder %s1884_s25, %s1880_s20  ;;  %p1888_p2 = scmp.lt.u32.totalorder %s1880_s20, %s2352_s13 }
 0xa08   : > { %p1882_p6 = pnand %p1881_p0, %p2439_p3 }
 0xa09   : > { %p1887_p10 = por %p1886_p12, %p1885_p9 }
 0xa0a   : > { %p1883_p5 = pneg %p1882_p6 }
 0xa0b   : > { %p1889_p4 = por %p1888_p2, %p1887_p10 }
 0xa0d   : > { %p1890_p7 = pnand %p1889_p4, %p1883_p5 }
 0xa0f   : > { %1893 = shalt.err (!%p1890_p7)
}
 0xa10   : > { %1638 = dma.vmem_to_hbm [thread:$0]  (%p2439_p3), %s2354_s27, 128, %s2352_s13, %s1337_s29  }
 0xa11 PF: > { %s2440_s14 = sld [smem:[#allocation19_spill]]  ;;  %s2441_s22 = sld [smem:[#allocation17_spill]] }
 0xa12   : > { %s2442_s16 = sld [smem:[#allocation22_spill]] }
 0xa17   : > { %p1665_p8 = scmp.ge.s32.totalorder %s2440_s14, 2  ;;  %s1362_s28 = sand.u32 1, %s2441_s22  }
 0xa18   : > { %p2443_p11 = scmp.ne.s32.totalorder %s2442_s16, 0  ;;  %s1363_s17 = scalar_lea.sflag [#allocation6], %s1362_s28 }
 0xa1a   : > { %p1654_p13 = pnand %p1665_p8, %p2443_p11 }
 0xa1c   : > { %1923 = dma.done.wait (!%p1654_p13), %s1363_s17, 128  }
 0xa1d   : > { %1925 = vsyncadd (!%p1654_p13), %s1363_s17, 4294967168  ;;  %s2444_s28 = sld [smem:[#allocation20_spill]]  ;;  %s2445_s19 = sld [smem:[#allocation18_spill]] }
 0xa1e   : > { %s2446_s27 = sld [smem:[#allocation21_spill]]  ;;  %s2447_s25 = smov %s1932_s26 }
 0xa23   : > { %p26_p1 = scmp.ge.s32.totalorder %s2444_s28, 4   ;;  %s2448_s26 = smov %s2445_s19 }
 0xa25   :  { %28 = sbr.rel (!%p26_p1) target bundleno = 8 (0x8), region = 124 }
 0xa2c   :  { %1368 = vsyncpa [#allocation5], 1 }
 0xa2d   :  { %1370 = vsyncpa [#allocation5 + $0x1], 1 }
 0xa2e   :  { %1371 = vsyncpa [#allocation8], 1 }
 0xa2f   :  { %1372 = vsyncpa [#allocation11], 1 }
 0xa30   :  { %1373 = vsyncpa [#allocation6], 1 }
 0xa31   :  { %1375 = vsyncpa [#allocation6 + $0x1], 1 }

</bundles_post_ra>
